<compile_context>
chip_gen: v6e
topology: v6e:2x2x1
jax: 0.10.0
libtpu: 0.0.40
codegen_flags: <defaults>
</compile_context>

<pallas_src>
import functools

import jax
import jax.numpy as jnp
from jax import lax
from jax.experimental import pallas as pl
from jax.experimental.pallas import tpu as pltpu

_NEG_INF = -1e9
_MIB = 1024 * 1024


# --------------------------------------------------------------------------
# In-kernel building blocks
# --------------------------------------------------------------------------
def _layer_norm(x, gamma, beta, eps):
    mean = jnp.mean(x, axis=-1, keepdims=True)
    centered = x - mean
    var = jnp.mean(centered * centered, axis=-1, keepdims=True)
    return centered * lax.rsqrt(var + eps) * gamma + beta


def _causal_mask(row0, rows, cols):
    """Additive causal mask built in-kernel (no HBM traffic)."""
    r = row0 + lax.broadcasted_iota(jnp.int32, (rows, cols), 0)
    c = lax.broadcasted_iota(jnp.int32, (rows, cols), 1)
    return jnp.where(c <= r, 0.0, _NEG_INF).astype(jnp.float32)


def _attn_ln_ffn(x_f32, q, kv, mask, w1, b1, w2, b2, g1, be1, g2, be2, *,
                 n_heads, head_dim, model_dim, mxu_dtype, eps):
    """Shared per-tile compute: multi-head attention (1/sqrt(d) pre-folded into
    the Q projection), residual + LN1, FFN, residual + LN2."""
    q16 = q.astype(mxu_dtype)                       # cast once, slice per head
    head_outs = []
    for h in range(n_heads):
        lo = h * head_dim
        qh = q16[:, lo:lo + head_dim]
        kh = kv[:, lo:lo + head_dim]
        vh = kv[:, model_dim + lo:model_dim + lo + head_dim]
        # QK^T contracting the head dim of both operands: no kh.T / XLU work.
        scores = lax.dot_general(qh, kh, (((1,), (1,)), ((), ())),
                                 preferred_element_type=jnp.float32)
        scores = scores + mask                       # mask math stays f32
        m = jnp.max(scores, axis=-1, keepdims=True)
        p = jnp.exp(scores - m)
        denom = jnp.sum(p, axis=-1, keepdims=True)
        # EUP reciprocal + one Newton step: essentially free vs the VPU divide,
        # and normalizes the small (TQ, d) head output instead of the (TQ, L)
        # probability matrix.
        r = pl.reciprocal(denom, approx=True)
        r = r * (2.0 - denom * r)
        oh = jnp.dot(p.astype(mxu_dtype), vh, preferred_element_type=jnp.float32)
        head_outs.append(oh * r)
    att = jnp.concatenate(head_outs, axis=-1)        # (TQ, D) lane-dense

    # Residual + LayerNorm 1 (f32).
    h1 = _layer_norm(x_f32 + att, g1, be1, eps)
    # Feed-forward (dropout is identity in eval mode).
    ff = jnp.dot(h1.astype(mxu_dtype), w1, preferred_element_type=jnp.float32) + b1
    ff = jnp.maximum(ff, 0.0)
    ff = jnp.dot(ff.astype(mxu_dtype), w2, preferred_element_type=jnp.float32) + b2
    # Residual + LayerNorm 2 (f32).
    return _layer_norm(h1 + ff, g2, be2, eps)


# --------------------------------------------------------------------------
# Kernels
# --------------------------------------------------------------------------
def _kv_proj_kernel(x_ref, wkv_ref, bkv_ref, kv_ref):
    """One (row-tile, batch) step: x @ [Wk | Wv] + [bk | bv] in a single MXU pass."""
    x = x_ref[0]                                                 # (TR, D)
    kv = jnp.dot(x, wkv_ref[...], preferred_element_type=jnp.float32) + bkv_ref[...]
    kv_ref[0] = kv.astype(kv_ref.dtype)


def _encoder_tiled_kernel(x_ref, kv_ref, wq_ref, bq_ref, pad_ref, *rest,
                          n_heads, head_dim, mxu_dtype, eps, causal):
    """One grid step == one query tile of one batch element (K|V precomputed)."""
    if causal:
        (w1_ref, b1_ref, w2_ref, b2_ref,
         g1_ref, be1_ref, g2_ref, be2_ref, o_ref) = rest
        dep_ref = None
    else:
        (dep_ref, w1_ref, b1_ref, w2_ref, b2_ref,
         g1_ref, be1_ref, g2_ref, be2_ref, o_ref) = rest

    x = x_ref[0]                                                 # (TQ, D)
    x_f32 = x.astype(jnp.float32)
    tq, model_dim = x.shape
    kv = kv_ref[0]                                               # (L, 2D)
    l_pad = kv.shape[0]

    # Q projection (MXU, f32 accumulation; scale folded into Wq/bq).
    q = jnp.dot(x, wq_ref[...], preferred_element_type=jnp.float32) + bq_ref[...]

    if causal:
        mask = pad_ref[0] + _causal_mask(pl.program_id(1) * tq, tq, l_pad)
    else:
        mask = pad_ref[0] + dep_ref[...].astype(jnp.float32)

    out = _attn_ln_ffn(x_f32, q, kv, mask,
                       w1_ref[...], b1_ref[...], w2_ref[...], b2_ref[...],
                       g1_ref[...], be1_ref[...], g2_ref[...], be2_ref[...],
                       n_heads=n_heads, head_dim=head_dim, model_dim=model_dim,
                       mxu_dtype=mxu_dtype, eps=eps)
    o_ref[0] = out.astype(o_ref.dtype)


def _encoder_fused_kernel(x_ref, wq_ref, bq_ref, wkv_ref, bkv_ref, pad_ref, *rest,
                          n_heads, head_dim, mxu_dtype, eps, causal):
    """One grid step == one full (short) sequence: K/V projected in-kernel
    (no K/V HBM round trip, no second launch)."""
    if causal:
        (w1_ref, b1_ref, w2_ref, b2_ref,
         g1_ref, be1_ref, g2_ref, be2_ref, o_ref) = rest
        dep_ref = None
    else:
        (dep_ref, w1_ref, b1_ref, w2_ref, b2_ref,
         g1_ref, be1_ref, g2_ref, be2_ref, o_ref) = rest

    x = x_ref[0]                                                 # (L, D)
    x_f32 = x.astype(jnp.float32)
    l_pad, model_dim = x.shape

    q = jnp.dot(x, wq_ref[...], preferred_element_type=jnp.float32) + bq_ref[...]
    kv = (jnp.dot(x, wkv_ref[...], preferred_element_type=jnp.float32)
          + bkv_ref[...]).astype(mxu_dtype)                      # (L, 2D)

    if causal:
        mask = pad_ref[0] + _causal_mask(0, l_pad, l_pad)
    else:
        mask = pad_ref[0] + dep_ref[...].astype(jnp.float32)

    out = _attn_ln_ffn(x_f32, q, kv, mask,
                       w1_ref[...], b1_ref[...], w2_ref[...], b2_ref[...],
                       g1_ref[...], be1_ref[...], g2_ref[...], be2_ref[...],
                       n_heads=n_heads, head_dim=head_dim, model_dim=model_dim,
                       mxu_dtype=mxu_dtype, eps=eps)
    o_ref[0] = out.astype(o_ref.dtype)


# --------------------------------------------------------------------------
# Host-side helpers
# --------------------------------------------------------------------------
def prepare_params(params, n_heads, mxu_dtype=jnp.bfloat16):
    """One-time parameter prep (outside the forward path):
       * nn.Linear weights transposed from (out, in) to (in, out),
       * Wk|Wv and bk|bv concatenated for a single K|V MXU pass,
       * 1/sqrt(head_dim) pre-folded into Wq and bq,
       * MXU operands cast to the matmul dtype; biases / LN params stay f32."""
    f32 = jnp.float32
    D = params["wq"].shape[0]
    assert D % n_heads == 0
    scale = 1.0 / float(D // n_heads) ** 0.5
    wkv = jnp.concatenate([params["wk"].T, params["wv"].T], axis=1)      # (D, 2D)
    bkv = jnp.concatenate([params["bk"], params["bv"]]).reshape(1, -1)   # (1, 2D)
    return {
        "wq": (params["wq"].T * scale).astype(mxu_dtype),
        "bq": (params["bq"] * scale).reshape(1, -1).astype(f32),
        "wkv": wkv.astype(mxu_dtype),
        "bkv": bkv.astype(f32),
        "w1": params["w1"].T.astype(mxu_dtype),
        "w2": params["w2"].T.astype(mxu_dtype),
        "b1": params["b1"].reshape(1, -1).astype(f32),
        "b2": params["b2"].reshape(1, -1).astype(f32),
        "ln1_g": params["ln1_g"].reshape(1, -1).astype(f32),
        "ln1_b": params["ln1_b"].reshape(1, -1).astype(f32),
        "ln2_g": params["ln2_g"].reshape(1, -1).astype(f32),
        "ln2_b": params["ln2_b"].reshape(1, -1).astype(f32),
    }


def _pad_axis(x, target, axis, value=0.0):
    amount = target - x.shape[axis]
    if amount <= 0:
        return x
    widths = [(0, 0)] * x.ndim
    widths[axis] = (0, amount)
    return jnp.pad(x, widths, constant_values=value)


def _bspec(shape, index_map, single_buffer=False):
    """BlockSpec; constant-index weight blocks can be single-buffered to halve
    their VMEM cost (they never change, so double-buffering buys nothing)."""
    if single_buffer:
        try:
            return pl.BlockSpec(shape, index_map, pipeline_mode=pl.Buffered(1))
        except Exception:           # older jax without pipeline_mode support
            pass
    return pl.BlockSpec(shape, index_map)


def _pick_vmem_limit(footprint_bytes):
    """vmem_limit from the real per-step footprint, capped by device capacity
    minus headroom for Mosaic internal scratch (v7x only has 64 MiB total)."""
    try:
        cap = int(pltpu.get_tpu_info().vmem_capacity_bytes)
    except Exception:
        cap = 64 * _MIB                       # conservative (v7x-sized) default
    want = max(32 * _MIB, 2 * int(footprint_bytes))
    return int(max(min(want, cap - 8 * _MIB), 16 * _MIB))


# --------------------------------------------------------------------------
# Forward pass
# --------------------------------------------------------------------------
def transformer_encoder_layer(sequence, padding_mask, dependency_mask, prepared, *,
                              n_heads, q_tile=128, eps=1e-5,
                              out_dtype=jnp.float32, causal_dependency=False):
    """sequence: (B, L, D) f32; padding_mask: (B, L) additive; dependency_mask:
    (L, L) additive (ignored when causal_dependency=True — built in-kernel).
    q_tile: 128 is right for v5e; 256 fills the 256-wide MXU on v6e (and v7x
    once flash K/V tiling lands)."""
    B, L, D = sequence.shape
    assert D % n_heads == 0
    head_dim = D // n_heads
    mxu_dtype = prepared["wq"].dtype
    dim_ff = prepared["w1"].shape[1]
    itm = jnp.dtype(mxu_dtype).itemsize
    out_itm = jnp.dtype(out_dtype).itemsize

    # Pad L so tiles are sublane-aligned for the MXU dtype; pick the query tile.
    sub = 8 if itm == 4 else 16
    if L <= q_tile:
        l_pad = -(-L // sub) * sub
        tq = l_pad
    else:
        l_pad = -(-L // q_tile) * q_tile
        tq = q_tile
    n_q = l_pad // tq

    x = _pad_axis(sequence.astype(mxu_dtype), l_pad, axis=1)
    # NOTE: the residual stream is at MXU precision; use f32 prepared params if
    # tighter accuracy than bf16 is required.
    pad = _pad_axis(padding_mask.astype(jnp.float32), l_pad, axis=1,
                    value=_NEG_INF).reshape(B, 1, l_pad)

    dep = None
    if not causal_dependency:
        # Stream the dependency mask at the MXU precision (halves HBM traffic in
        # bf16 mode); the add itself stays in f32 inside the kernel.
        dep = dependency_mask.astype(mxu_dtype)
        dep = _pad_axis(_pad_axis(dep, l_pad, axis=0), l_pad, axis=1)

    # Only single-buffer the constant weight blocks once they are big enough
    # for VMEM to matter (production D / dim_ff); tiny blocks keep the default.
    weight_bytes = (D * D + 2 * D * dim_ff) * itm
    single_w = weight_bytes >= (1 * _MIB)

    ln_args = [prepared["ln1_g"], prepared["ln1_b"],
               prepared["ln2_g"], prepared["ln2_b"]]

    if n_q == 1:
        # ------------------------------------------------------------------
        # Fused single-tile path: no K/V HBM round trip, one launch.
        # ------------------------------------------------------------------
        kernel = functools.partial(_encoder_fused_kernel, n_heads=n_heads,
                                   head_dim=head_dim, mxu_dtype=mxu_dtype,
                                   eps=eps, causal=causal_dependency)
        in_specs = [
            pl.BlockSpec((1, l_pad, D), lambda b: (b, 0, 0)),        # x
            _bspec((D, D), lambda b: (0, 0), single_w),              # Wq (scaled)
            pl.BlockSpec((1, D), lambda b: (0, 0)),                  # bq (scaled)
            _bspec((D, 2 * D), lambda b: (0, 0), single_w),          # Wk|Wv
            pl.BlockSpec((1, 2 * D), lambda b: (0, 0)),              # bk|bv
            pl.BlockSpec((1, 1, l_pad), lambda b: (b, 0, 0)),        # padding mask
        ]
        args = [x, prepared["wq"], prepared["bq"], prepared["wkv"],
                prepared["bkv"], pad]
        if not causal_dependency:
            in_specs.append(pl.BlockSpec((l_pad, l_pad), lambda b: (0, 0)))
            args.append(dep)
        in_specs += [
            _bspec((D, dim_ff), lambda b: (0, 0), single_w),         # W1
            pl.BlockSpec((1, dim_ff), lambda b: (0, 0)),             # b1
            _bspec((dim_ff, D), lambda b: (0, 0), single_w),         # W2
            pl.BlockSpec((1, D), lambda b: (0, 0)),                  # b2
            pl.BlockSpec((1, D), lambda b: (0, 0)),                  # ln1 gamma
            pl.BlockSpec((1, D), lambda b: (0, 0)),                  # ln1 beta
            pl.BlockSpec((1, D), lambda b: (0, 0)),                  # ln2 gamma
            pl.BlockSpec((1, D), lambda b: (0, 0)),                  # ln2 beta
        ]
        args += [prepared["w1"], prepared["b1"], prepared["w2"], prepared["b2"]]
        args += ln_args

        footprint = (2 * l_pad * D * itm
                     + (3 * D * D + 2 * D * dim_ff) * itm * (1 if single_w else 2)
                     + 2 * l_pad * 4
                     + (0 if causal_dependency else 2 * l_pad * l_pad * itm)
                     + 2 * l_pad * D * out_itm
                     + 4 * (2 * l_pad * l_pad + l_pad * dim_ff + 6 * l_pad * D))
        cost = pl.CostEstimate(
            flops=int(B * (6 * l_pad * D * D + 4 * l_pad * l_pad * D
                           + 4 * l_pad * D * dim_ff)),
            transcendentals=int(B * n_heads * l_pad * l_pad + 2 * B * l_pad),
            bytes_accessed=int(B * l_pad * D * (itm + out_itm)
                               + (3 * D * D + 2 * D * dim_ff) * itm
                               + B * l_pad * 4
                               + (0 if causal_dependency else l_pad * l_pad * itm)))
        out = pl.pallas_call(
            kernel,
            out_shape=jax.ShapeDtypeStruct((B, l_pad, D), out_dtype),
            grid_spec=pltpu.PrefetchScalarGridSpec(
                num_scalar_prefetch=0,
                grid=(B,),
                in_specs=in_specs,
                out_specs=pl.BlockSpec((1, l_pad, D), lambda b: (b, 0, 0)),
            ),
            compiler_params=pltpu.CompilerParams(
                dimension_semantics=("parallel",),
                vmem_limit_bytes=_pick_vmem_limit(footprint)),
            cost_estimate=cost,
        )(*args)
        return out[:, :L, :]

    # ----------------------------------------------------------------------
    # Kernel 1: fused K|V projection over (batch, row-tile).  Row tile is
    # decoupled from q_tile and made large (~512 rows) for HBM efficiency.
    # ----------------------------------------------------------------------
    max_rows = min(l_pad, 512)
    mult = max(1, max_rows // tq)
    while mult > 1 and l_pad % (mult * tq) != 0:
        mult -= 1
    kv_rows = mult * tq
    n_r = l_pad // kv_rows

    kv_fp = (2 * kv_rows * D * itm
             + 2 * D * D * itm * (1 if single_w else 2) * 2
             + 2 * kv_rows * 2 * D * itm
             + 4 * kv_rows * 2 * D)
    cost_kv = pl.CostEstimate(
        flops=int(4 * B * l_pad * D * D),
        transcendentals=0,
        bytes_accessed=int(B * l_pad * D * itm + 2 * D * D * itm
                           + 2 * B * l_pad * D * itm))
    kv_arr = pl.pallas_call(
        _kv_proj_kernel,
        out_shape=jax.ShapeDtypeStruct((B, l_pad, 2 * D), mxu_dtype),
        grid_spec=pltpu.PrefetchScalarGridSpec(
            num_scalar_prefetch=0,
            grid=(B, n_r),
            in_specs=[
                pl.BlockSpec((1, kv_rows, D), lambda b, r: (b, r, 0)),   # x rows
                _bspec((D, 2 * D), lambda b, r: (0, 0), single_w),       # Wk|Wv
                pl.BlockSpec((1, 2 * D), lambda b, r: (0, 0)),           # bk|bv
            ],
            out_specs=pl.BlockSpec((1, kv_rows, 2 * D), lambda b, r: (b, r, 0)),
        ),
        compiler_params=pltpu.CompilerParams(
            dimension_semantics=("parallel", "parallel"),
            vmem_limit_bytes=_pick_vmem_limit(kv_fp)),
        cost_estimate=cost_kv,
    )(x, prepared["wkv"], prepared["bkv"])

    # ----------------------------------------------------------------------
    # Kernel 2: fused attention + LN1 + FFN + LN2 over (batch, query-tile).
    # TODO(synk): add a kv-chunk grid axis with online softmax for very long L.
    # ----------------------------------------------------------------------
    kernel = functools.partial(_encoder_tiled_kernel, n_heads=n_heads,
                               head_dim=head_dim, mxu_dtype=mxu_dtype,
                               eps=eps, causal=causal_dependency)
    in_specs = [
        pl.BlockSpec((1, tq, D), lambda b, qi: (b, qi, 0)),          # x tile
        pl.BlockSpec((1, l_pad, 2 * D), lambda b, qi: (b, 0, 0)),    # K|V (full seq)
        _bspec((D, D), lambda b, qi: (0, 0), single_w),              # Wq (scaled)
        pl.BlockSpec((1, D), lambda b, qi: (0, 0)),                  # bq (scaled)
        pl.BlockSpec((1, 1, l_pad), lambda b, qi: (b, 0, 0)),        # padding mask
    ]
    args = [x, kv_arr, prepared["wq"], prepared["bq"], pad]
    if not causal_dependency:
        in_specs.append(pl.BlockSpec((tq, l_pad), lambda b, qi: (qi, 0)))
        args.append(dep)
    in_specs += [
        _bspec((D, dim_ff), lambda b, qi: (0, 0), single_w),         # W1
        pl.BlockSpec((1, dim_ff), lambda b, qi: (0, 0)),             # b1
        _bspec((dim_ff, D), lambda b, qi: (0, 0), single_w),         # W2
        pl.BlockSpec((1, D), lambda b, qi: (0, 0)),                  # b2
        pl.BlockSpec((1, D), lambda b, qi: (0, 0)),                  # ln1 gamma
        pl.BlockSpec((1, D), lambda b, qi: (0, 0)),                  # ln1 beta
        pl.BlockSpec((1, D), lambda b, qi: (0, 0)),                  # ln2 gamma
        pl.BlockSpec((1, D), lambda b, qi: (0, 0)),                  # ln2 beta
    ]
    args += [prepared["w1"], prepared["b1"], prepared["w2"], prepared["b2"]]
    args += ln_args

    footprint = (2 * tq * D * itm
                 + 2 * l_pad * 2 * D * itm
                 + (D * D + 2 * D * dim_ff) * itm * (1 if single_w else 2)
                 + 2 * l_pad * 4
                 + (0 if causal_dependency else 2 * tq * l_pad * itm)
                 + 2 * tq * D * out_itm
                 + 4 * (2 * tq * l_pad + tq * dim_ff + 6 * tq * D))
    cost_enc = pl.CostEstimate(
        flops=int(B * (2 * l_pad * D * D + 4 * l_pad * l_pad * D
                       + 4 * l_pad * D * dim_ff)),
        transcendentals=int(B * n_heads * l_pad * l_pad + 2 * B * l_pad),
        bytes_accessed=int(B * l_pad * D * (3 * itm + out_itm)
                           + (D * D + 2 * D * dim_ff) * itm
                           + B * l_pad * 4
                           + (0 if causal_dependency else l_pad * l_pad * itm)))
    out = pl.pallas_call(
        kernel,
        out_shape=jax.ShapeDtypeStruct((B, l_pad, D), out_dtype),
        grid_spec=pltpu.PrefetchScalarGridSpec(
            num_scalar_prefetch=0,
            grid=(B, n_q),
            in_specs=in_specs,
            out_specs=pl.BlockSpec((1, tq, D), lambda b, qi: (b, qi, 0)),
        ),
        compiler_params=pltpu.CompilerParams(
            dimension_semantics=("parallel", "parallel"),
            vmem_limit_bytes=_pick_vmem_limit(footprint)),
        cost_estimate=cost_enc,
    )(*args)
    return out[:, :L, :]


# --------------------------------------------------------------------------
# Pure-JAX reference (mirrors the PyTorch forward semantics, eval mode)
# --------------------------------------------------------------------------
def _reference(sequence, padding_mask, dependency_mask, params, n_heads, eps=1e-5):
    B, L, D = sequence.shape
    d = D // n_heads
    q = (sequence @ params["wq"].T + params["bq"]).reshape(B, L, n_heads, d)
    k = (sequence @ params["wk"].T + params["bk"]).reshape(B, L, n_heads, d)
    v = (sequence @ params["wv"].T + params["bv"]).reshape(B, L, n_heads, d)
    scores = jnp.einsum("bqhd,bkhd->bhqk", q, k) / jnp.sqrt(jnp.float32(d))
    scores = scores + padding_mask[:, None, None, :] + dependency_mask[None, None]
    attn = jax.nn.softmax(scores, axis=-1)
    att = jnp.einsum("bhqk,bkhd->bqhd", attn, v).reshape(B, L, D)

    def ln(x, g, b):
        mean = x.mean(-1, keepdims=True)
        var = ((x - mean) ** 2).mean(-1, keepdims=True)
        return (x - mean) / jnp.sqrt(var + eps) * g + b

    x = ln(sequence + att, params["ln1_g"], params["ln1_b"])
    ff = jax.nn.relu(x @ params["w1"].T + params["b1"]) @ params["w2"].T + params["b2"]
    return ln(x + ff, params["ln2_g"], params["ln2_b"])


if __name__ == "__main__":
    D, H, F = 32, 4, 64

    key = jax.random.PRNGKey(0)
    ks = jax.random.split(key, 20)
    nrm = jax.random.normal
    params = {
        "wq": 0.1 * nrm(ks[0], (D, D), jnp.float32),
        "bq": 0.1 * nrm(ks[1], (D,), jnp.float32),
        "wk": 0.1 * nrm(ks[2], (D, D), jnp.float32),
        "bk": 0.1 * nrm(ks[3], (D,), jnp.float32),
        "wv": 0.1 * nrm(ks[4], (D, D), jnp.float32),
        "bv": 0.1 * nrm(ks[5], (D,), jnp.float32),
        "w1": 0.1 * nrm(ks[6], (F, D), jnp.float32),
        "b1": 0.1 * nrm(ks[7], (F,), jnp.float32),
        "w2": 0.1 * nrm(ks[8], (D, F), jnp.float32),
        "b2": 0.1 * nrm(ks[9], (D,), jnp.float32),
        "ln1_g": 1.0 + 0.1 * nrm(ks[10], (D,), jnp.float32),
        "ln1_b": 0.1 * nrm(ks[11], (D,), jnp.float32),
        "ln2_g": 1.0 + 0.1 * nrm(ks[12], (D,), jnp.float32),
        "ln2_b": 0.1 * nrm(ks[13], (D,), jnp.float32),
    }

    def make_inputs(kx, B, L, n_padded):
        seq = nrm(kx, (B, L, D), jnp.float32)
        pad_mask = jnp.zeros((B, L), jnp.float32).at[1, L - n_padded:].set(-1e9)
        dep_mask = jnp.where(jnp.tril(jnp.ones((L, L), jnp.bool_)),
                             0.0, -1e9).astype(jnp.float32)
        return seq, pad_mask, dep_mask

    prep_f32 = prepare_params(params, H, jnp.float32)
    prep_bf16 = prepare_params(params, H, jnp.bfloat16)

    # ---- short sequence: fused single-tile path (no K/V round trip) --------
    seq_s, pad_s, dep_s = make_inputs(ks[14], 2, 8, 2)
    ref_s = _reference(seq_s, pad_s, dep_s, params, H)

    fwd_f32 = jax.jit(functools.partial(transformer_encoder_layer, n_heads=H))
    out = jax.block_until_ready(fwd_f32(seq_s, pad_s, dep_s, prep_f32))
    assert out.shape == (2, 8, D)
    assert jnp.allclose(out, ref_s, atol=2e-4, rtol=2e-4), "f32 fused-path mismatch"

    # bf16 MXU operands + in-kernel causal mask (no (L,L) mask streamed).
    fwd_bf16_causal = jax.jit(functools.partial(
        transformer_encoder_layer, n_heads=H, causal_dependency=True))
    out = jax.block_until_ready(fwd_bf16_causal(seq_s, pad_s, dep_s, prep_bf16))
    assert out.shape == (2, 8, D)
    assert jnp.allclose(out, ref_s, atol=3e-2, rtol=3e-2), "bf16 causal fused-path mismatch"

    # ---- longer sequence: K|V projection kernel + query-tiled encoder ------
    seq_l, pad_l, dep_l = make_inputs(ks[15], 2, 80, 5)
    ref_l = _reference(seq_l, pad_l, dep_l, params, H)

    fwd_f32_tiled = jax.jit(functools.partial(
        transformer_encoder_layer, n_heads=H, q_tile=32))
    out = jax.block_until_ready(fwd_f32_tiled(seq_l, pad_l, dep_l, prep_f32))
    assert out.shape == (2, 80, D)
    assert jnp.allclose(out, ref_l, atol=2e-4, rtol=2e-4), "f32 tiled-path mismatch"

    # bf16 fast path with bf16 output (halved writeback).
    fwd_bf16_tiled = jax.jit(functools.partial(
        transformer_encoder_layer, n_heads=H, q_tile=32, out_dtype=jnp.bfloat16))
    out = jax.block_until_ready(fwd_bf16_tiled(seq_l, pad_l, dep_l, prep_bf16))
    assert out.shape == (2, 80, D) and out.dtype == jnp.bfloat16
    assert jnp.allclose(out.astype(jnp.float32), ref_l,
                        atol=5e-2, rtol=5e-2), "bf16 tiled-path mismatch"

    print("KERNEL_OK")
</pallas_src>

<mosaic_0001>
module attributes {stable_mosaic.version = 11 : i64} {
  func.func @_encoder_fused_kernel(%arg0: i32, %arg1: memref<1x8x32xf32, #tpu.memory_space<vmem>>, %arg2: memref<32x32xf32, #tpu.memory_space<vmem>>, %arg3: memref<1x32xf32, #tpu.memory_space<vmem>>, %arg4: memref<32x64xf32, #tpu.memory_space<vmem>>, %arg5: memref<1x64xf32, #tpu.memory_space<vmem>>, %arg6: memref<1x1x8xf32, #tpu.memory_space<vmem>>, %arg7: memref<8x8xf32, #tpu.memory_space<vmem>>, %arg8: memref<32x64xf32, #tpu.memory_space<vmem>>, %arg9: memref<1x64xf32, #tpu.memory_space<vmem>>, %arg10: memref<64x32xf32, #tpu.memory_space<vmem>>, %arg11: memref<1x32xf32, #tpu.memory_space<vmem>>, %arg12: memref<1x32xf32, #tpu.memory_space<vmem>>, %arg13: memref<1x32xf32, #tpu.memory_space<vmem>>, %arg14: memref<1x32xf32, #tpu.memory_space<vmem>>, %arg15: memref<1x32xf32, #tpu.memory_space<vmem>>, %arg16: memref<1x8x32xf32, #tpu.memory_space<vmem>>) attributes {dimension_semantics = [#tpu.dimension_semantics<parallel>], iteration_bounds = array<i64: 2>, scalar_prefetch = 0 : i64, scratch_operands = 0 : i64, tpu.core_type = #tpu.core_type<tc>, window_params = [{transform_indices = @transform_0, window_bounds = array<i64: 1, 8, 32>}, {pipeline_mode = #tpu.pipeline_mode<synchronous>, transform_indices = @transform_1, window_bounds = array<i64: 32, 32>}, {pipeline_mode = #tpu.pipeline_mode<synchronous>, transform_indices = @transform_2, window_bounds = array<i64: 1, 32>}, {pipeline_mode = #tpu.pipeline_mode<synchronous>, transform_indices = @transform_3, window_bounds = array<i64: 32, 64>}, {pipeline_mode = #tpu.pipeline_mode<synchronous>, transform_indices = @transform_4, window_bounds = array<i64: 1, 64>}, {transform_indices = @transform_5, window_bounds = array<i64: 1, 1, 8>}, {pipeline_mode = #tpu.pipeline_mode<synchronous>, transform_indices = @transform_6, window_bounds = array<i64: 8, 8>}, {pipeline_mode = #tpu.pipeline_mode<synchronous>, transform_indices = @transform_7, window_bounds = array<i64: 32, 64>}, {pipeline_mode = #tpu.pipeline_mode<synchronous>, transform_indices = @transform_8, window_bounds = array<i64: 1, 64>}, {pipeline_mode = #tpu.pipeline_mode<synchronous>, transform_indices = @transform_9, window_bounds = array<i64: 64, 32>}, {pipeline_mode = #tpu.pipeline_mode<synchronous>, transform_indices = @transform_10, window_bounds = array<i64: 1, 32>}, {pipeline_mode = #tpu.pipeline_mode<synchronous>, transform_indices = @transform_11, window_bounds = array<i64: 1, 32>}, {pipeline_mode = #tpu.pipeline_mode<synchronous>, transform_indices = @transform_12, window_bounds = array<i64: 1, 32>}, {pipeline_mode = #tpu.pipeline_mode<synchronous>, transform_indices = @transform_13, window_bounds = array<i64: 1, 32>}, {pipeline_mode = #tpu.pipeline_mode<synchronous>, transform_indices = @transform_14, window_bounds = array<i64: 1, 32>}, {transform_indices = @transform_15, window_bounds = array<i64: 1, 8, 32>}]} {
    %c0 = arith.constant 0 : index
    %c0_0 = arith.constant 0 : index
    %c0_1 = arith.constant 0 : index
    %0 = vector.load %arg1[%c0, %c0_0, %c0_1] : memref<1x8x32xf32, #tpu.memory_space<vmem>>, vector<1x8x32xf32>
    %1 = vector.shape_cast %0 : vector<1x8x32xf32> to vector<8x32xf32>
    %c0_2 = arith.constant 0 : index
    %c0_3 = arith.constant 0 : index
    %2 = vector.load %arg2[%c0_2, %c0_3] : memref<32x32xf32, #tpu.memory_space<vmem>>, vector<32x32xf32>
    %cst = arith.constant dense<0.000000e+00> : vector<8x32xf32>
    %3 = tpu.matmul %1, %2, %cst {dimension_numbers = #tpu.dot_dimension_numbers<[1], [0], [0], [1], [0, 0, 1, 1], [], []>} : vector<8x32xf32>, vector<32x32xf32>, vector<8x32xf32> -> vector<8x32xf32>
    %c0_4 = arith.constant 0 : index
    %c0_5 = arith.constant 0 : index
    %4 = vector.load %arg3[%c0_4, %c0_5] : memref<1x32xf32, #tpu.memory_space<vmem>>, vector<1x32xf32>
    %5 = vector.broadcast %4 : vector<1x32xf32> to vector<8x32xf32>
    %6 = arith.addf %3, %5 : vector<8x32xf32>
    %c0_6 = arith.constant 0 : index
    %c0_7 = arith.constant 0 : index
    %7 = vector.load %arg4[%c0_6, %c0_7] : memref<32x64xf32, #tpu.memory_space<vmem>>, vector<32x64xf32>
    %cst_8 = arith.constant dense<0.000000e+00> : vector<8x64xf32>
    %8 = tpu.matmul %1, %7, %cst_8 {dimension_numbers = #tpu.dot_dimension_numbers<[1], [0], [0], [1], [0, 0, 1, 1], [], []>} : vector<8x32xf32>, vector<32x64xf32>, vector<8x64xf32> -> vector<8x64xf32>
    %c0_9 = arith.constant 0 : index
    %c0_10 = arith.constant 0 : index
    %9 = vector.load %arg5[%c0_9, %c0_10] : memref<1x64xf32, #tpu.memory_space<vmem>>, vector<1x64xf32>
    %10 = vector.broadcast %9 : vector<1x64xf32> to vector<8x64xf32>
    %11 = arith.addf %8, %10 : vector<8x64xf32>
    %c0_11 = arith.constant 0 : index
    %c0_12 = arith.constant 0 : index
    %c0_13 = arith.constant 0 : index
    %12 = vector.load %arg6[%c0_11, %c0_12, %c0_13] : memref<1x1x8xf32, #tpu.memory_space<vmem>>, vector<1x1x8xf32>
    %13 = vector.shape_cast %12 : vector<1x1x8xf32> to vector<1x8xf32>
    %c0_14 = arith.constant 0 : index
    %c0_15 = arith.constant 0 : index
    %14 = vector.load %arg7[%c0_14, %c0_15] : memref<8x8xf32, #tpu.memory_space<vmem>>, vector<8x8xf32>
    %15 = vector.broadcast %13 : vector<1x8xf32> to vector<8x8xf32>
    %16 = arith.addf %15, %14 : vector<8x8xf32>
    %c0_16 = arith.constant 0 : index
    %c0_17 = arith.constant 0 : index
    %17 = vector.load %arg8[%c0_16, %c0_17] : memref<32x64xf32, #tpu.memory_space<vmem>>, vector<32x64xf32>
    %c0_18 = arith.constant 0 : index
    %c0_19 = arith.constant 0 : index
    %18 = vector.load %arg9[%c0_18, %c0_19] : memref<1x64xf32, #tpu.memory_space<vmem>>, vector<1x64xf32>
    %c0_20 = arith.constant 0 : index
    %c0_21 = arith.constant 0 : index
    %19 = vector.load %arg10[%c0_20, %c0_21] : memref<64x32xf32, #tpu.memory_space<vmem>>, vector<64x32xf32>
    %c0_22 = arith.constant 0 : index
    %c0_23 = arith.constant 0 : index
    %20 = vector.load %arg11[%c0_22, %c0_23] : memref<1x32xf32, #tpu.memory_space<vmem>>, vector<1x32xf32>
    %c0_24 = arith.constant 0 : index
    %c0_25 = arith.constant 0 : index
    %21 = vector.load %arg12[%c0_24, %c0_25] : memref<1x32xf32, #tpu.memory_space<vmem>>, vector<1x32xf32>
    %c0_26 = arith.constant 0 : index
    %c0_27 = arith.constant 0 : index
    %22 = vector.load %arg13[%c0_26, %c0_27] : memref<1x32xf32, #tpu.memory_space<vmem>>, vector<1x32xf32>
    %c0_28 = arith.constant 0 : index
    %c0_29 = arith.constant 0 : index
    %23 = vector.load %arg14[%c0_28, %c0_29] : memref<1x32xf32, #tpu.memory_space<vmem>>, vector<1x32xf32>
    %c0_30 = arith.constant 0 : index
    %c0_31 = arith.constant 0 : index
    %24 = vector.load %arg15[%c0_30, %c0_31] : memref<1x32xf32, #tpu.memory_space<vmem>>, vector<1x32xf32>
    %25 = vector.extract_strided_slice %6 {offsets = [0, 0], sizes = [8, 8], strides = [1, 1]} : vector<8x32xf32> to vector<8x8xf32>
    %26 = vector.extract_strided_slice %11 {offsets = [0, 0], sizes = [8, 8], strides = [1, 1]} : vector<8x64xf32> to vector<8x8xf32>
    %27 = vector.extract_strided_slice %11 {offsets = [0, 32], sizes = [8, 8], strides = [1, 1]} : vector<8x64xf32> to vector<8x8xf32>
    %cst_32 = arith.constant dense<0.000000e+00> : vector<8x8xf32>
    %28 = tpu.matmul %25, %26, %cst_32 {dimension_numbers = #tpu.dot_dimension_numbers<[1], [1], [0], [0], [0, 0, 1, 0], [], []>} : vector<8x8xf32>, vector<8x8xf32>, vector<8x8xf32> -> vector<8x8xf32>
    %29 = arith.addf %28, %16 : vector<8x8xf32>
    %cst_33 = arith.constant dense<0xFF800000> : vector<8xf32>
    %30 = vector.multi_reduction <maximumf>, %29, %cst_33 [1] : vector<8x8xf32> to vector<8xf32>
    %31 = vector.shape_cast %30 : vector<8xf32> to vector<8x1xf32>
    %32 = vector.broadcast %31 : vector<8x1xf32> to vector<8x8xf32>
    %33 = arith.subf %29, %32 : vector<8x8xf32>
    %34 = math.exp %33 : vector<8x8xf32>
    %cst_34 = arith.constant dense<0.000000e+00> : vector<8xf32>
    %35 = vector.multi_reduction <add>, %34, %cst_34 [1] : vector<8x8xf32> to vector<8xf32>
    %36 = vector.shape_cast %35 : vector<8xf32> to vector<8x1xf32>
    %37 = tpu.reciprocal %36 {approx = true} : vector<8x1xf32> -> vector<8x1xf32>
    %38 = arith.mulf %36, %37 : vector<8x1xf32>
    %cst_35 = arith.constant 2.000000e+00 : f32
    %39 = vector.broadcast %cst_35 : f32 to vector<8x1xf32>
    %40 = arith.subf %39, %38 : vector<8x1xf32>
    %41 = arith.mulf %37, %40 : vector<8x1xf32>
    %cst_36 = arith.constant dense<0.000000e+00> : vector<8x8xf32>
    %42 = tpu.matmul %34, %27, %cst_36 {dimension_numbers = #tpu.dot_dimension_numbers<[1], [0], [0], [1], [0, 0, 1, 1], [], []>} : vector<8x8xf32>, vector<8x8xf32>, vector<8x8xf32> -> vector<8x8xf32>
    %43 = vector.broadcast %41 : vector<8x1xf32> to vector<8x8xf32>
    %44 = arith.mulf %42, %43 : vector<8x8xf32>
    %45 = vector.extract_strided_slice %6 {offsets = [0, 8], sizes = [8, 8], strides = [1, 1]} : vector<8x32xf32> to vector<8x8xf32>
    %46 = vector.extract_strided_slice %11 {offsets = [0, 8], sizes = [8, 8], strides = [1, 1]} : vector<8x64xf32> to vector<8x8xf32>
    %47 = vector.extract_strided_slice %11 {offsets = [0, 40], sizes = [8, 8], strides = [1, 1]} : vector<8x64xf32> to vector<8x8xf32>
    %cst_37 = arith.constant dense<0.000000e+00> : vector<8x8xf32>
    %48 = tpu.matmul %45, %46, %cst_37 {dimension_numbers = #tpu.dot_dimension_numbers<[1], [1], [0], [0], [0, 0, 1, 0], [], []>} : vector<8x8xf32>, vector<8x8xf32>, vector<8x8xf32> -> vector<8x8xf32>
    %49 = arith.addf %48, %16 : vector<8x8xf32>
    %cst_38 = arith.constant dense<0xFF800000> : vector<8xf32>
    %50 = vector.multi_reduction <maximumf>, %49, %cst_38 [1] : vector<8x8xf32> to vector<8xf32>
    %51 = vector.shape_cast %50 : vector<8xf32> to vector<8x1xf32>
    %52 = vector.broadcast %51 : vector<8x1xf32> to vector<8x8xf32>
    %53 = arith.subf %49, %52 : vector<8x8xf32>
    %54 = math.exp %53 : vector<8x8xf32>
    %cst_39 = arith.constant dense<0.000000e+00> : vector<8xf32>
    %55 = vector.multi_reduction <add>, %54, %cst_39 [1] : vector<8x8xf32> to vector<8xf32>
    %56 = vector.shape_cast %55 : vector<8xf32> to vector<8x1xf32>
    %57 = tpu.reciprocal %56 {approx = true} : vector<8x1xf32> -> vector<8x1xf32>
    %58 = arith.mulf %56, %57 : vector<8x1xf32>
    %cst_40 = arith.constant 2.000000e+00 : f32
    %59 = vector.broadcast %cst_40 : f32 to vector<8x1xf32>
    %60 = arith.subf %59, %58 : vector<8x1xf32>
    %61 = arith.mulf %57, %60 : vector<8x1xf32>
    %cst_41 = arith.constant dense<0.000000e+00> : vector<8x8xf32>
    %62 = tpu.matmul %54, %47, %cst_41 {dimension_numbers = #tpu.dot_dimension_numbers<[1], [0], [0], [1], [0, 0, 1, 1], [], []>} : vector<8x8xf32>, vector<8x8xf32>, vector<8x8xf32> -> vector<8x8xf32>
    %63 = vector.broadcast %61 : vector<8x1xf32> to vector<8x8xf32>
    %64 = arith.mulf %62, %63 : vector<8x8xf32>
    %65 = vector.extract_strided_slice %6 {offsets = [0, 16], sizes = [8, 8], strides = [1, 1]} : vector<8x32xf32> to vector<8x8xf32>
    %66 = vector.extract_strided_slice %11 {offsets = [0, 16], sizes = [8, 8], strides = [1, 1]} : vector<8x64xf32> to vector<8x8xf32>
    %67 = vector.extract_strided_slice %11 {offsets = [0, 48], sizes = [8, 8], strides = [1, 1]} : vector<8x64xf32> to vector<8x8xf32>
    %cst_42 = arith.constant dense<0.000000e+00> : vector<8x8xf32>
    %68 = tpu.matmul %65, %66, %cst_42 {dimension_numbers = #tpu.dot_dimension_numbers<[1], [1], [0], [0], [0, 0, 1, 0], [], []>} : vector<8x8xf32>, vector<8x8xf32>, vector<8x8xf32> -> vector<8x8xf32>
    %69 = arith.addf %68, %16 : vector<8x8xf32>
    %cst_43 = arith.constant dense<0xFF800000> : vector<8xf32>
    %70 = vector.multi_reduction <maximumf>, %69, %cst_43 [1] : vector<8x8xf32> to vector<8xf32>
    %71 = vector.shape_cast %70 : vector<8xf32> to vector<8x1xf32>
    %72 = vector.broadcast %71 : vector<8x1xf32> to vector<8x8xf32>
    %73 = arith.subf %69, %72 : vector<8x8xf32>
    %74 = math.exp %73 : vector<8x8xf32>
    %cst_44 = arith.constant dense<0.000000e+00> : vector<8xf32>
    %75 = vector.multi_reduction <add>, %74, %cst_44 [1] : vector<8x8xf32> to vector<8xf32>
    %76 = vector.shape_cast %75 : vector<8xf32> to vector<8x1xf32>
    %77 = tpu.reciprocal %76 {approx = true} : vector<8x1xf32> -> vector<8x1xf32>
    %78 = arith.mulf %76, %77 : vector<8x1xf32>
    %cst_45 = arith.constant 2.000000e+00 : f32
    %79 = vector.broadcast %cst_45 : f32 to vector<8x1xf32>
    %80 = arith.subf %79, %78 : vector<8x1xf32>
    %81 = arith.mulf %77, %80 : vector<8x1xf32>
    %cst_46 = arith.constant dense<0.000000e+00> : vector<8x8xf32>
    %82 = tpu.matmul %74, %67, %cst_46 {dimension_numbers = #tpu.dot_dimension_numbers<[1], [0], [0], [1], [0, 0, 1, 1], [], []>} : vector<8x8xf32>, vector<8x8xf32>, vector<8x8xf32> -> vector<8x8xf32>
    %83 = vector.broadcast %81 : vector<8x1xf32> to vector<8x8xf32>
    %84 = arith.mulf %82, %83 : vector<8x8xf32>
    %85 = vector.extract_strided_slice %6 {offsets = [0, 24], sizes = [8, 8], strides = [1, 1]} : vector<8x32xf32> to vector<8x8xf32>
    %86 = vector.extract_strided_slice %11 {offsets = [0, 24], sizes = [8, 8], strides = [1, 1]} : vector<8x64xf32> to vector<8x8xf32>
    %87 = vector.extract_strided_slice %11 {offsets = [0, 56], sizes = [8, 8], strides = [1, 1]} : vector<8x64xf32> to vector<8x8xf32>
    %cst_47 = arith.constant dense<0.000000e+00> : vector<8x8xf32>
    %88 = tpu.matmul %85, %86, %cst_47 {dimension_numbers = #tpu.dot_dimension_numbers<[1], [1], [0], [0], [0, 0, 1, 0], [], []>} : vector<8x8xf32>, vector<8x8xf32>, vector<8x8xf32> -> vector<8x8xf32>
    %89 = arith.addf %88, %16 : vector<8x8xf32>
    %cst_48 = arith.constant dense<0xFF800000> : vector<8xf32>
    %90 = vector.multi_reduction <maximumf>, %89, %cst_48 [1] : vector<8x8xf32> to vector<8xf32>
    %91 = vector.shape_cast %90 : vector<8xf32> to vector<8x1xf32>
    %92 = vector.broadcast %91 : vector<8x1xf32> to vector<8x8xf32>
    %93 = arith.subf %89, %92 : vector<8x8xf32>
    %94 = math.exp %93 : vector<8x8xf32>
    %cst_49 = arith.constant dense<0.000000e+00> : vector<8xf32>
    %95 = vector.multi_reduction <add>, %94, %cst_49 [1] : vector<8x8xf32> to vector<8xf32>
    %96 = vector.shape_cast %95 : vector<8xf32> to vector<8x1xf32>
    %97 = tpu.reciprocal %96 {approx = true} : vector<8x1xf32> -> vector<8x1xf32>
    %98 = arith.mulf %96, %97 : vector<8x1xf32>
    %cst_50 = arith.constant 2.000000e+00 : f32
    %99 = vector.broadcast %cst_50 : f32 to vector<8x1xf32>
    %100 = arith.subf %99, %98 : vector<8x1xf32>
    %101 = arith.mulf %97, %100 : vector<8x1xf32>
    %cst_51 = arith.constant dense<0.000000e+00> : vector<8x8xf32>
    %102 = tpu.matmul %94, %87, %cst_51 {dimension_numbers = #tpu.dot_dimension_numbers<[1], [0], [0], [1], [0, 0, 1, 1], [], []>} : vector<8x8xf32>, vector<8x8xf32>, vector<8x8xf32> -> vector<8x8xf32>
    %103 = vector.broadcast %101 : vector<8x1xf32> to vector<8x8xf32>
    %104 = arith.mulf %102, %103 : vector<8x8xf32>
    %105 = tpu.concatenate %44, %64, %84, %104 in 1 : vector<8x8xf32>, vector<8x8xf32>, vector<8x8xf32>, vector<8x8xf32> -> vector<8x32xf32>
    %106 = arith.addf %1, %105 : vector<8x32xf32>
    %cst_52 = arith.constant dense<0.000000e+00> : vector<8xf32>
    %107 = vector.multi_reduction <add>, %106, %cst_52 [1] : vector<8x32xf32> to vector<8xf32>
    %108 = vector.shape_cast %107 : vector<8xf32> to vector<8x1xf32>
    %cst_53 = arith.constant 3.200000e+01 : f32
    %109 = vector.broadcast %cst_53 : f32 to vector<8x1xf32>
    %110 = arith.divf %108, %109 : vector<8x1xf32>
    %111 = vector.broadcast %110 : vector<8x1xf32> to vector<8x32xf32>
    %112 = arith.subf %106, %111 : vector<8x32xf32>
    %113 = arith.mulf %112, %112 : vector<8x32xf32>
    %cst_54 = arith.constant dense<0.000000e+00> : vector<8xf32>
    %114 = vector.multi_reduction <add>, %113, %cst_54 [1] : vector<8x32xf32> to vector<8xf32>
    %115 = vector.shape_cast %114 : vector<8xf32> to vector<8x1xf32>
    %cst_55 = arith.constant 3.200000e+01 : f32
    %116 = vector.broadcast %cst_55 : f32 to vector<8x1xf32>
    %117 = arith.divf %115, %116 : vector<8x1xf32>
    %cst_56 = arith.constant 9.99999974E-6 : f32
    %118 = vector.broadcast %cst_56 : f32 to vector<8x1xf32>
    %119 = arith.addf %117, %118 : vector<8x1xf32>
    %120 = math.rsqrt %119 : vector<8x1xf32>
    %121 = vector.broadcast %120 : vector<8x1xf32> to vector<8x32xf32>
    %122 = arith.mulf %112, %121 : vector<8x32xf32>
    %123 = vector.broadcast %21 : vector<1x32xf32> to vector<8x32xf32>
    %124 = arith.mulf %122, %123 : vector<8x32xf32>
    %125 = vector.broadcast %22 : vector<1x32xf32> to vector<8x32xf32>
    %126 = arith.addf %124, %125 : vector<8x32xf32>
    %cst_57 = arith.constant dense<0.000000e+00> : vector<8x64xf32>
    %127 = tpu.matmul %126, %17, %cst_57 {dimension_numbers = #tpu.dot_dimension_numbers<[1], [0], [0], [1], [0, 0, 1, 1], [], []>} : vector<8x32xf32>, vector<32x64xf32>, vector<8x64xf32> -> vector<8x64xf32>
    %128 = vector.broadcast %18 : vector<1x64xf32> to vector<8x64xf32>
    %129 = arith.addf %127, %128 : vector<8x64xf32>
    %cst_58 = arith.constant 0.000000e+00 : f32
    %130 = vector.broadcast %cst_58 : f32 to vector<8x64xf32>
    %131 = arith.maximumf %129, %130 : vector<8x64xf32>
    %cst_59 = arith.constant dense<0.000000e+00> : vector<8x32xf32>
    %132 = tpu.matmul %131, %19, %cst_59 {dimension_numbers = #tpu.dot_dimension_numbers<[1], [0], [0], [1], [0, 0, 1, 1], [], []>} : vector<8x64xf32>, vector<64x32xf32>, vector<8x32xf32> -> vector<8x32xf32>
    %133 = vector.broadcast %20 : vector<1x32xf32> to vector<8x32xf32>
    %134 = arith.addf %132, %133 : vector<8x32xf32>
    %135 = arith.addf %126, %134 : vector<8x32xf32>
    %cst_60 = arith.constant dense<0.000000e+00> : vector<8xf32>
    %136 = vector.multi_reduction <add>, %135, %cst_60 [1] : vector<8x32xf32> to vector<8xf32>
    %137 = vector.shape_cast %136 : vector<8xf32> to vector<8x1xf32>
    %cst_61 = arith.constant 3.200000e+01 : f32
    %138 = vector.broadcast %cst_61 : f32 to vector<8x1xf32>
    %139 = arith.divf %137, %138 : vector<8x1xf32>
    %140 = vector.broadcast %139 : vector<8x1xf32> to vector<8x32xf32>
    %141 = arith.subf %135, %140 : vector<8x32xf32>
    %142 = arith.mulf %141, %141 : vector<8x32xf32>
    %cst_62 = arith.constant dense<0.000000e+00> : vector<8xf32>
    %143 = vector.multi_reduction <add>, %142, %cst_62 [1] : vector<8x32xf32> to vector<8xf32>
    %144 = vector.shape_cast %143 : vector<8xf32> to vector<8x1xf32>
    %cst_63 = arith.constant 3.200000e+01 : f32
    %145 = vector.broadcast %cst_63 : f32 to vector<8x1xf32>
    %146 = arith.divf %144, %145 : vector<8x1xf32>
    %cst_64 = arith.constant 9.99999974E-6 : f32
    %147 = vector.broadcast %cst_64 : f32 to vector<8x1xf32>
    %148 = arith.addf %146, %147 : vector<8x1xf32>
    %149 = math.rsqrt %148 : vector<8x1xf32>
    %150 = vector.broadcast %149 : vector<8x1xf32> to vector<8x32xf32>
    %151 = arith.mulf %141, %150 : vector<8x32xf32>
    %152 = vector.broadcast %23 : vector<1x32xf32> to vector<8x32xf32>
    %153 = arith.mulf %151, %152 : vector<8x32xf32>
    %154 = vector.broadcast %24 : vector<1x32xf32> to vector<8x32xf32>
    %155 = arith.addf %153, %154 : vector<8x32xf32>
    %c0_65 = arith.constant 0 : index
    %c0_66 = arith.constant 0 : index
    %c0_67 = arith.constant 0 : index
    %156 = vector.load %arg16[%c0_65, %c0_66, %c0_67] : memref<1x8x32xf32, #tpu.memory_space<vmem>>, vector<1x8x32xf32>
    %157 = vector.shape_cast %156 : vector<1x8x32xf32> to vector<8x32xf32>
    %158 = vector.shape_cast %155 : vector<8x32xf32> to vector<1x8x32xf32>
    tpu.vector_store %arg16[%c0_65, %c0_66, %c0_67], %158 {strides = array<i32>} : memref<1x8x32xf32, #tpu.memory_space<vmem>>, vector<1x8x32xf32>,
    return
  }
  func.func @transform_0(%arg0: i32) -> (i32, i32, i32) {
    %c0_i32 = arith.constant 0 : i32
    %c0_i32_0 = arith.constant 0 : i32
    %c0_i32_1 = arith.constant 0 : i32
    return %arg0, %c0_i32, %c0_i32_0 : i32, i32, i32
  }
  func.func @transform_1(%arg0: i32) -> (i32, i32) {
    %c0_i32 = arith.constant 0 : i32
    %c0_i32_0 = arith.constant 0 : i32
    %c0_i32_1 = arith.constant 0 : i32
    return %c0_i32, %c0_i32_0 : i32, i32
  }
  func.func @transform_2(%arg0: i32) -> (i32, i32) {
    %c0_i32 = arith.constant 0 : i32
    %c0_i32_0 = arith.constant 0 : i32
    %c0_i32_1 = arith.constant 0 : i32
    return %c0_i32, %c0_i32_0 : i32, i32
  }
  func.func @transform_3(%arg0: i32) -> (i32, i32) {
    %c0_i32 = arith.constant 0 : i32
    %c0_i32_0 = arith.constant 0 : i32
    %c0_i32_1 = arith.constant 0 : i32
    return %c0_i32, %c0_i32_0 : i32, i32
  }
  func.func @transform_4(%arg0: i32) -> (i32, i32) {
    %c0_i32 = arith.constant 0 : i32
    %c0_i32_0 = arith.constant 0 : i32
    %c0_i32_1 = arith.constant 0 : i32
    return %c0_i32, %c0_i32_0 : i32, i32
  }
  func.func @transform_5(%arg0: i32) -> (i32, i32, i32) {
    %c0_i32 = arith.constant 0 : i32
    %c0_i32_0 = arith.constant 0 : i32
    %c0_i32_1 = arith.constant 0 : i32
    return %arg0, %c0_i32, %c0_i32_0 : i32, i32, i32
  }
  func.func @transform_6(%arg0: i32) -> (i32, i32) {
    %c0_i32 = arith.constant 0 : i32
    %c0_i32_0 = arith.constant 0 : i32
    %c0_i32_1 = arith.constant 0 : i32
    return %c0_i32, %c0_i32_0 : i32, i32
  }
  func.func @transform_7(%arg0: i32) -> (i32, i32) {
    %c0_i32 = arith.constant 0 : i32
    %c0_i32_0 = arith.constant 0 : i32
    %c0_i32_1 = arith.constant 0 : i32
    return %c0_i32, %c0_i32_0 : i32, i32
  }
  func.func @transform_8(%arg0: i32) -> (i32, i32) {
    %c0_i32 = arith.constant 0 : i32
    %c0_i32_0 = arith.constant 0 : i32
    %c0_i32_1 = arith.constant 0 : i32
    return %c0_i32, %c0_i32_0 : i32, i32
  }
  func.func @transform_9(%arg0: i32) -> (i32, i32) {
    %c0_i32 = arith.constant 0 : i32
    %c0_i32_0 = arith.constant 0 : i32
    %c0_i32_1 = arith.constant 0 : i32
    return %c0_i32, %c0_i32_0 : i32, i32
  }
  func.func @transform_10(%arg0: i32) -> (i32, i32) {
    %c0_i32 = arith.constant 0 : i32
    %c0_i32_0 = arith.constant 0 : i32
    %c0_i32_1 = arith.constant 0 : i32
    return %c0_i32, %c0_i32_0 : i32, i32
  }
  func.func @transform_11(%arg0: i32) -> (i32, i32) {
    %c0_i32 = arith.constant 0 : i32
    %c0_i32_0 = arith.constant 0 : i32
    %c0_i32_1 = arith.constant 0 : i32
    return %c0_i32, %c0_i32_0 : i32, i32
  }
  func.func @transform_12(%arg0: i32) -> (i32, i32) {
    %c0_i32 = arith.constant 0 : i32
    %c0_i32_0 = arith.constant 0 : i32
    %c0_i32_1 = arith.constant 0 : i32
    return %c0_i32, %c0_i32_0 : i32, i32
  }
  func.func @transform_13(%arg0: i32) -> (i32, i32) {
    %c0_i32 = arith.constant 0 : i32
    %c0_i32_0 = arith.constant 0 : i32
    %c0_i32_1 = arith.constant 0 : i32
    return %c0_i32, %c0_i32_0 : i32, i32
  }
  func.func @transform_14(%arg0: i32) -> (i32, i32) {
    %c0_i32 = arith.constant 0 : i32
    %c0_i32_0 = arith.constant 0 : i32
    %c0_i32_1 = arith.constant 0 : i32
    return %c0_i32, %c0_i32_0 : i32, i32
  }
  func.func @transform_15(%arg0: i32) -> (i32, i32, i32) {
    %c0_i32 = arith.constant 0 : i32
    %c0_i32_0 = arith.constant 0 : i32
    %c0_i32_1 = arith.constant 0 : i32
    return %arg0, %c0_i32, %c0_i32_0 : i32, i32, i32
  }
}

</mosaic_0001>

<bundles_post_ra>
// kernel: transformer_encoder_layer.1
= control target key start
LH: loop header
LB: loop body
LE: loop exit
PB: predicated region body
PF: predicated region fallthrough
CT: control target
= control target key end

     0   :  { %s2581_s0 = inlined_call_operand.hbm [shape: f32[2,8,32], index: 0, kind: input, shape index: {}]   ;;  %s2582_s1 = inlined_call_operand.vmem [shape: f32[32,32], index: 1, kind: input, shape index: {}]   ;;  %s2583_s2 = inlined_call_operand.vmem [shape: f32[1,32], index: 2, kind: input, shape index: {}]   ;;  %s2584_s3 = inlined_call_operand.vmem [shape: f32[32,64], index: 3, kind: input, shape index: {}]   ;;  %s2585_s4 = inlined_call_operand.vmem [shape: f32[1,64], index: 4, kind: input, shape index: {}]   ;;  %s2586_s5 = inlined_call_operand.vmem [shape: f32[2,1,8], index: 5, kind: input, shape index: {}]   ;;  %s2587_s6 = inlined_call_operand.hbm [shape: f32[8,8], index: 6, kind: input, shape index: {}]   ;;  %s2588_s7 = inlined_call_operand.vmem [shape: f32[32,64], index: 7, kind: input, shape index: {}]   ;;  %s2589_s8 = inlined_call_operand.vmem [shape: f32[1,64], index: 8, kind: input, shape index: {}]   ;;  %s2590_s9 = inlined_call_operand.vmem [shape: f32[64,32], index: 9, kind: input, shape index: {}]   ;;  %s2591_s10 = inlined_call_operand.vmem [shape: f32[1,32], index: 10, kind: input, shape index: {}]   ;;  %s2592_s11 = inlined_call_operand.vmem [shape: f32[1,32], index: 11, kind: input, shape index: {}]   ;;  %s2593_s12 = inlined_call_operand.vmem [shape: f32[1,32], index: 12, kind: input, shape index: {}]   ;;  %s2594_s13 = inlined_call_operand.vmem [shape: f32[1,32], index: 13, kind: input, shape index: {}]   ;;  %s2595_s14 = inlined_call_operand.vmem [shape: f32[1,32], index: 14, kind: input, shape index: {}]   ;;  %s2596_s15 = inlined_call_operand.hbm [shape: f32[2,8,32], index: 15, kind: output, shape index: {}]  }
   0x1   :  { %2608 = sst [smem:[#allocation17_spill]] %s2587_s6 }
   0x2   :  { %2609 = sst [smem:[#allocation18_spill]] %s2594_s13 }
   0x3   :  { %2610 = sst [smem:[#allocation19_spill]] %s2595_s14 }
   0x4   :  { %2611 = sst [smem:[#allocation20_spill]] %s2596_s15 }
   0x5   :  { %20 = vsyncpa [#allocation3], 0 }
   0x6   :  { %22 = vsyncpa [#allocation3 + $0x1], 0 }
   0x7   :  { %23 = vsyncpa [#allocation6], 0 }
   0x8   :  { %24 = vsyncpa [#allocation4], 0 }
   0x9   :  { %26 = vsyncpa [#allocation4 + $0x1], 0  ;;  %s2219_s18 = smov 0   ;;  %s2221_s19 = smov 0  }
   0xa   :  { %s2223_s20 = smov 0   ;;  %s2225_s21 = smov 0  }
   0xb LB: > { %2612 = sst [smem:[#allocation11_spill]] %s2110_s18  ;;  %s2240_s22 = sadd.s32 4294967295, %s2122_s21   ;;  %s2122_s21 = sphi %s2225_s21, %s2641_s21   ;;  %s2118_s20 = sphi %s2223_s20, %s2643_s20   ;;  %s2114_s19 = sphi %s2221_s19, %s2645_s19   ;;  %s2110_s18 = sphi %s2219_s18, %s2644_s18  }
   0xc   : > { %2613 = sst [smem:[#allocation12_spill]] %s2118_s20  ;;  %s1740_s23 = sadd.s32 4294967294, %s2122_s21  }
   0xd   : > { %2614 = sst [smem:[#allocation13_spill]] %s2122_s21  ;;  %p52_p0 = scmp.ne.s32.totalorder %s2114_s19, %s2110_s18 }
   0xe   : > { %p2597_p1 = scmp.eq.s32.totalorder %s2240_s22, 0  ;;  %p381_p3 = scmp.eq.s32.totalorder %s1740_s23, 1 }
   0xf   : > { %p1741_p5 = scmp.ge.s32.totalorder %s2122_s21, 1  ;;  %p388_p7 = scmp.lt.s32.totalorder %s2122_s21, 3 }
  0x10   : > { %p2249_p4 = por %p2597_p1, %p52_p0  ;;  %p2254_p6 = por %p381_p3, %p52_p0 }
  0x11   : > { %p2259_p8 = pnand %p1741_p5, %p388_p7  ;;  %s2124_s27 = smov [#allocation5]  }
  0x12   : > { %s2615_s24 = scalar_select %p2249_p4, 1, 0 }
  0x13   : > { %s2616_s25 = scalar_select %p2254_p6, 1, 0 }
  0x14   : > { %s2618_s26 = scalar_select %p2259_p8, 1, 0 }
  0x15   : > { %2617 = sst [smem:[#allocation14_spill]] %s2616_s25  ;;  %s413_s28 = sshll.u32 %s2124_s27, 4  ;;  %s414_s28 = int_to_ptr.vmem [resolvable:$true] %s413_s28 }
  0x16   : > { %p1919_p10 = pneg %p2259_p8  ;;  %s2267_s29 = sadd.s32 1, %s2122_s21  }
  0x17   : > { %2619 = sst [smem:[#allocation15_spill]] %s2267_s29  ;;  %s36_s16 = ssub.s32 %s2122_s21, %s2267_s29 }
  0x18   : > { %p2271_p11 = pnand %p1919_p10, %p2597_p1  ;;  %p2277_p12 = scmp.eq.s32.totalorder %s36_s16, 0 }
  0x19   : > { %s39_s23 = sadd.s32 1, %s2118_s20  ;;  %p46_p13 = scmp.ne.s32.totalorder %s2118_s20, %s2114_s19 }
  0x1a   : > { %p2002_p0 = pneg %p2271_p11  ;;  %s2011_s27 = scalar_lea.vmem %s414_s28, 128 }
  0x1b   : > { %p2012_p3 = scmp.ne.s32.totalorder %s414_s28, %s2011_s27  ;;  %p2019_p9 = scmp.lt.s32.totalorder %s414_s28, %s414_s28 }
  0x1c   : > { %p2020_p2 = scmp.lt.s32.totalorder %s2011_s27, %s2011_s27 }
  0x1d   : > { %p2014_p5 = pnand %p2012_p3, %p2002_p0 }
  0x1e   : > { %p2021_p10 = por %p2020_p2, %p2019_p9 }
  0x1f   : > { %p2015_p7 = pneg %p2014_p5 }
  0x21   : > { %p2022_p1 = pnand %p2021_p10, %p2015_p7 }
  0x23   : > { %2025 = shalt.err (!%p2022_p1)
}
  0x24   : > { %s2622_s6 = sld [smem:[#allocation17_spill]]  ;;  %p47_p1 = scmp.eq.s32.totalorder %s2122_s21, 0 }
  0x25   : > { %s2294_s27 = scalar_select %p2277_p12, %s2118_s20, %s39_s23  }
  0x26   : > { %p2624_p2 = scmp.eq.s32.totalorder %s2240_s22, 1  ;;  %p1932_p0 = scmp.lt.s32.totalorder %s2122_s21, 2 }
  0x27   : > { %2623 = sst [smem:[#allocation16_spill]] %s2294_s27  ;;  %s448_s30 = sand.u32 1, %s2118_s20  }
  0x28   : > { %p2302_p9 = por %p2624_p2, %p46_p13  ;;  %p48_p3 = por %p47_p1, %p46_p13 }
  0x29   : > { %s1744_s16 = sshll.u32 %s448_s30, 3  ;;  %s1745_s25 = sshll.u32 %s2122_s21, 7 }
  0x2a   : > { %1922 = dma.hbm_to_vmem [thread:$0]  (!%p2271_p11), %s2622_s6, 128, %s414_s28, [#allocation6]  }
  0x2b   : > { %s2625_s29 = scalar_select %p2302_p9, 1, 0 }
  0x2c   : > { %s2315_s28 = scalar_lea.hbm %s2581_s0, %s1745_s25  ;;  %s452_s17 = scalar_lea.vmem [#allocation2], %s1744_s16 }
  0x2d   : > { %s459_s23 = sshll.u32 %s452_s17, 4  ;;  %p2317_p11 = pnand %p1932_p0, %p48_p3  ;;  %s460_s23 = int_to_ptr.vmem [resolvable:$true] %s459_s23 }
  0x2e   : > { %s449_s27 = scalar_lea.sflag [#allocation3], %s448_s30  ;;  %s2026_s20 = scalar_lea.hbm %s2315_s28, 128 }
  0x2f   : > { %p2027_p12 = scmp.ne.s32.totalorder %s2315_s28, %s2026_s20  ;;  %p2028_p13 = pneg %p2317_p11 }
  0x30   : > { %s2031_s25 = scalar_lea.hbm %s2581_s0, 256  ;;  %p2032_p10 = scmp.lt.s32.totalorder %s2315_s28, %s2581_s0 }
  0x31   : > { %p2029_p5 = pnand %p2028_p13, %p2027_p12  ;;  %p2033_p1 = scmp.lt.s32.totalorder %s2031_s25, %s2026_s20 }
  0x33   : > { %p2030_p7 = pneg %p2029_p5  ;;  %p2034_p2 = por %p2033_p1, %p2032_p10 }
  0x35   : > { %p2035_p0 = pnand %p2034_p2, %p2030_p7 }
  0x37   : > { %2038 = shalt.err (!%p2035_p0)
}
  0x38   : > { %s2039_s17 = scalar_lea.vmem %s460_s23, 128  ;;  %s2125_s30 = smov [#allocation2]  }
  0x39   : > { %p2040_p3 = scmp.ne.s32.totalorder %s460_s23, %s2039_s17  ;;  %s2044_s14 = sshll.u32 %s2125_s30, 4  ;;  %s2045_s14 = int_to_ptr.vmem [resolvable:$false] %s2044_s14 }
  0x3a   : > { %s2046_s13 = scalar_lea.vmem %s2045_s14, 256  ;;  %p2047_p12 = scmp.lt.s32.totalorder %s460_s23, %s2045_s14 }
  0x3b   : > { %p2042_p6 = pnand %p2040_p3, %p2028_p13  ;;  %p2048_p5 = scmp.lt.s32.totalorder %s2046_s13, %s2039_s17 }
  0x3d   : > { %p2043_p9 = pneg %p2042_p6  ;;  %p2049_p4 = por %p2048_p5, %p2047_p12 }
  0x3f   : > { %p2050_p8 = pnand %p2049_p4, %p2043_p9 }
  0x41   : > { %2053 = shalt.err (!%p2050_p8)
}
  0x42   : > { %1926 = dma.hbm_to_vmem [thread:$0]  (!%p2317_p11), %s2315_s28, 128, %s460_s23, %s449_s27  }
  0x43   : > { %p2627_p7 = scmp.ne.s32.totalorder %s2618_s26, 0 }
  0x44   : > { %s2338_s20 = sand.u32 (!%p2627_p7), 1, %s2114_s19   ;;  %p2628_p4 = scmp.ne.s32.totalorder (!%p2627_p7), %s2615_s24, 0 }
  0x45   : > { %474 = sbr.rel (%p2627_p7) target bundleno = 2338 (0x922), region = 80  ;;  %s1747_s21 = sshll.u32 (!%p2627_p7), %s2338_s20, 3 }
  0x46   : > { %s477_s14 = scalar_lea.sflag (!%p2627_p7), [#allocation3], %s2338_s20  ;;  %s480_s13 = scalar_lea.vmem (!%p2627_p7), [#allocation2], %s1747_s21 }
  0x4a   : > { %2097 = dma.done.wait (%p2628_p4), %s477_s14, 128  }
  0x4b   : > { %2099 = vsyncadd (%p2628_p4), %s477_s14, 4294967168  ;;  %p2629_p6 = scmp.eq.s32.totalorder %s2240_s22, 0 }
  0x4d   : > { %2101 = dma.done.wait (%p2629_p6), [#allocation6], 128   ;;  %p2630_p8 = pmov %p2629_p6 }
  0x4e   : > { %v2126_v0 = vmov 0.0   ;;  %vm2127_vm0 = vmmov 0   ;;  %v626_v1 = vld [vmem:[%s2584_s3 + $0x18] sm:$0xff]  ;;  %v625_v3 = vld [vmem:[%s2584_s3 + $0x10] sm:$0xff]  ;;  %v624_v5 = vld [vmem:[%s2584_s3 + $0x8] sm:$0xff]  ;;  %vm549_vm1 = vcmask 261120  }
  0x4f   : > { %2103 = vsyncadd (%p2630_p8), [#allocation6], 4294967168  ;;  %1830 = vmatprep.subr.mxu1 %v2126_v0  ;;  %1819 = vmatprep.subr.mxu0 %v2126_v0  ;;  %v541_v2 = vld [vmem:[%s2582_s1 + $0x18] sm:$0xff]  ;;  %v540_v4 = vld [vmem:[%s2582_s1 + $0x10] sm:$0xff]  ;;  %vm731_vm2 = vcmask 64512   ;;  %s2128_s15 = smov 120  }
  0x50   : > { %1838 = vmatprep.mubr.msk.f32.mxu1 %vm2127_vm0, %v2126_v0  ;;  %1827 = vmatprep.mubr.msk.f32.mxu0 %vm2127_vm0, %v2126_v0  ;;  %v539_v6 = vld [vmem:[%s2582_s1 + $0x8] sm:$0xff]  ;;  %v623_v7 = vld [vmem:[%s2584_s3] sm:$0xff]  ;;  %s2129_s18 = smov 112   ;;  %s2130_s25 = smov 104   ;;  %v705_v19 = vld [vmem:[#allocation5] sm:$0xff]  ;;  %vm1415_vm3 = vcmask 130048  }
  0x51   : > { %1831 = vmatpush3.msra.mxu1 %v626_v1  ;;  %1820 = vmatpush3.msra.mxu0 %v541_v2  ;;  %v538_v8 = vld [vmem:[%s2582_s1] sm:$0xff]  ;;  %p534_p9 = scmp.lt.s32.totalorder %s2240_s22, 1  ;;  %s2131_s6 = smov 96   ;;  %vm1417_vm4 = vcmask 195584   ;;  %vm1534_vm5 = vcmask 523264  }
  0x52   : > { %1832 = vmatprep.subr.mxu1 %v2126_v0  ;;  %1821 = vmatprep.subr.mxu0 %v2126_v0  ;;  %v2386_v9 = vld [vmem:[%s480_s13] sm:$0xff]  ;;  %s2132_s24 = smov 88   ;;  %s2133_s26 = smov 72  }
  0x53   : > { %1833 = vmatpush3.msra.mxu1 %v625_v3  ;;  %1822 = vmatpush3.msra.mxu0 %v540_v4  ;;  %v1752_v10 = vld [vmem:[%s2585_s4] ss:$0 sm:$0xff]  ;;  %s535_s16 = scalar_select %p534_p9, %s2240_s22, 1 }
  0x54   : > { %1834 = vmatprep.subr.mxu1 %v2126_v0  ;;  %1823 = vmatprep.subr.mxu0 %v2126_v0  ;;  %v1750_v11 = vld [vmem:[%s2583_s2] ss:$0 sm:$0xff]  ;;  %s2134_s13 = smov 80   ;;  %s2135_s27 = smov 8  }
  0x55   : > { %1835 = vmatpush3.msra.mxu1 %v624_v5  ;;  %1824 = vmatpush3.msra.mxu0 %v539_v6  ;;  %s536_s14 = scalar_lea.vmem %s2586_s5, %s535_s16  ;;  %s2136_s28 = smov 16  }
  0x56   : > { %1836 = vmatprep.subr.mxu1 %v2126_v0  ;;  %1825 = vmatprep.subr.mxu0 %v2126_v0  ;;  %v1754_v18 = vld [vmem:[%s536_s14] ss:$0 sm:$0xff]  ;;  %s2137_s23 = smov 24   ;;  %s2631_s14 = sld [smem:[#allocation18_spill]] }
  0x57   : > { %1837 = vmatpush3.msra.mxu1 %v623_v7  ;;  %1826 = vmatpush3.msra.mxu0 %v538_v8  ;;  %v712_v20 = vadd.f32 %v1754_v18, %v705_v19  ;;  %s1638_s17 = scalar_lea.sflag [#allocation4], %s2338_s20  ;;  %p2635_p13 = scmp.ne.s32.totalorder %s2625_s29, 0 }
  0x58   : > { %1839 = vmatmul.mubr.msk.f32.vlgmr.msra.gmra.mxu1 %vm549_vm1, %v2386_v9  ;;  %1828 = vmatmul.mubr.msk.f32.vlgmr.msra.gmra.mxu0 %vm549_vm1, %v2386_v9 }
  0x59   : > { %1841 = vmatprep.subr.mxu0 %v2126_v0  ;;  %1843 = vmatprep.mubr.msk.f32.mxu0 %vm2127_vm0, %v2126_v0 }
  0x5a   : > { %1856 = vmatprep.subr.mxu1 %v2126_v0  ;;  %1858 = vmatprep.mubr.msk.f32.mxu1 %vm2127_vm0, %v2126_v0 }
 0x118   : > { %v700_v12 = vpop.f32.mrf.mxu1  ;;  %v619_v13 = vpop.f32.mrf.mxu0 }
 0x119   : > { %v2406_v14 = vadd.f32 %v1752_v10, %v700_v12  ;;  %v620_v15 = vadd.f32 %v1750_v11, %v619_v13 }
 0x11a   : > { %v1840_v16 = vpop.f32.mrf.mxu1  ;;  %v1829_v17 = vpop.f32.mrf.mxu0 }
 0x11b   : > { %900 = vrot.lane.b32.xlu1 %v2406_v14, %s2128_s15  ;;  %1842 = vmatpush3.xpose.msk.msra.mxu0 %vm731_vm2, %v2406_v14 }
 0x11c   : > { %1846 = vmatprep.subr.mxu0 %v2126_v0 }
 0x11e   : > { %1844 = vmatmul.mubr.msk.f32.vlgmr.msra.gmra.mxu0 %vm731_vm2, %v620_v15 }
 0x11f   : > { %898 = vrot.lane.b32.xlu1 %v620_v15, %s2128_s15  ;;  %1848 = vmatprep.mubr.msk.f32.mxu0 %vm2127_vm0, %v2126_v0 }
 0x123   : > { %1068 = vrot.lane.b32.xlu1 %v2406_v14, %s2129_s18 }
 0x127   : > { %1066 = vrot.lane.b32.xlu1 %v620_v15, %s2129_s18  ;;  %s2633_s18 = sld [smem:[#allocation20_spill]] }
 0x12b   : > { %1236 = vrot.lane.b32.xlu1 %v2406_v14, %s2130_s25 }
 0x12f   : > { %1234 = vrot.lane.b32.xlu1 %v620_v15, %s2130_s25  ;;  %s2634_s25 = smov %s2633_s18 }
 0x18d   : > { %v901_v25 = vpop.permute.xlu1 %900 }
 0x191   : > { %v899_v30 = vpop.permute.xlu1 %898 }
 0x195   : > { %v1069_v31 = vpop.permute.xlu1 %1068 }
 0x199   : > { %v1067_v33 = vpop.permute.xlu1 %1066 }
 0x19d   : > { %v1237_v34 = vpop.permute.xlu1 %1236 }
 0x1a1   : > { %v1235_v35 = vpop.permute.xlu1 %1234 }
 0x1de   : > { %v804_v21 = vpop.f32.mrf.mxu0 }
 0x1df   : > { %v805_v22 = vadd.f32 %v804_v21, %v712_v20 }
 0x1e0   : > { %v1845_v23 = vpop.f32.mrf.mxu0 }
 0x1e1   : > { %v808_v24 = vsel %vm731_vm2, %v805_v22, -inf }
 0x1e2   : > { %809 = vmax.xlane.f32.xlu0 %v808_v24 }
 0x1f8   : > { %821 = vrot.lane.b32.xlu0 %v2406_v14, %s2131_s6 }
 0x26b   : > { %v810_v26 = vpop.xlane.xlu0 %809 }
 0x26c   : > { %v811_v27 = vsub.f32 %v805_v22, %v810_v26 }
 0x26e   : > { %v812_v28 = vmul.f32 1.442695, %v811_v27 }
 0x26f   : > { %v822_v29 = vpop.permute.xlu0 %821 }
 0x270   : > { %1980 = vpow2.f32 %v812_v28  ;;  %1847 = vmatpush3.msra.mxu0 %v822_v29 }
 0x271   : > { %1851 = vmatprep.subr.mxu0 %v2126_v0 }
 0x27d   : > { %v2425_v32 = vpop.eup %1980 }
 0x27e   : > { %1849 = vmatmul.mubr.msk.f32.vlgmr.msra.gmra.mxu0 %vm731_vm2, %v2425_v32  ;;  %v814_v2 = vsel %vm731_vm2, %v2425_v32, 0.0 }
 0x27f   : > { %1852 = vmatpush3.xpose.msk.msra.mxu0 %vm731_vm2, %v901_v25  ;;  %1853 = vmatprep.mubr.msk.f32.mxu0 %vm2127_vm0, %v2126_v0 }
 0x280   : > { %1861 = vmatprep.subr.mxu0 %v2126_v0 }
 0x282   : > { %1854 = vmatmul.mubr.msk.f32.vlgmr.msra.gmra.mxu0 %vm731_vm2, %v899_v30 }
 0x283   : > { %1862 = vmatpush3.xpose.msk.msra.mxu0 %vm731_vm2, %v1069_v31  ;;  %1863 = vmatprep.mubr.msk.f32.mxu0 %vm2127_vm0, %v2126_v0 }
 0x284   : > { %1871 = vmatprep.subr.mxu0 %v2126_v0 }
 0x286   : > { %1864 = vmatmul.mubr.msk.f32.vlgmr.msra.gmra.mxu0 %vm731_vm2, %v1067_v33 }
 0x287   : > { %1872 = vmatpush3.xpose.msk.msra.mxu0 %vm731_vm2, %v1237_v34  ;;  %1873 = vmatprep.mubr.msk.f32.mxu0 %vm2127_vm0, %v2126_v0 }
 0x288   : > { %1881 = vmatprep.subr.mxu0 %v2126_v0 }
 0x28a   : > { %1874 = vmatmul.mubr.msk.f32.vlgmr.msra.gmra.mxu0 %vm731_vm2, %v1235_v35 }
 0x28b   : > { %1889 = vmatprep.mubr.msk.f32.mxu0 %vm2127_vm0, %v2126_v0 }
 0x33e   : > { %v2446_v36 = vpop.f32.mrf.mxu0 }
 0x340   : > { %v1850_v37 = vpop.f32.mrf.mxu0 }
 0x342   : > { %v972_v38 = vpop.f32.mrf.mxu0 }
 0x343   : > { %v973_v39 = vadd.f32 %v972_v38, %v712_v20 }
 0x344   : > { %v1855_v40 = vpop.f32.mrf.mxu0 }
 0x345   : > { %v976_v41 = vsel %vm731_vm2, %v973_v39, -inf }
 0x346   : > { %977 = vmax.xlane.f32.xlu1 %v976_v41  ;;  %v1140_v42 = vpop.f32.mrf.mxu0 }
 0x347   : > { %v1141_v43 = vadd.f32 %v1140_v42, %v712_v20 }
 0x348   : > { %v1865_v44 = vpop.f32.mrf.mxu0 }
 0x349   : > { %v1144_v45 = vsel %vm731_vm2, %v1141_v43, -inf }
 0x34a   : > { %1145 = vmax.xlane.f32.xlu0 %v1144_v45  ;;  %v1308_v46 = vpop.f32.mrf.mxu0 }
 0x34b   : > { %v1309_v47 = vadd.f32 %v1308_v46, %v712_v20 }
 0x34c   : > { %v1875_v48 = vpop.f32.mrf.mxu0 }
 0x34d   : > { %v1312_v49 = vsel %vm731_vm2, %v1309_v47, -inf }
 0x34e   : > { %1313 = vmax.xlane.f32.xlu0 %v1312_v49 }
 0x357   : > { %989 = vrot.lane.b32.xlu1 %v2406_v14, %s2132_s24 }
 0x35b   : > { %1325 = vrot.lane.b32.xlu1 %v2406_v14, %s2133_s26  ;;  %s2632_s26 = sld [smem:[#allocation19_spill]] }
 0x364   : > { %1157 = vrot.lane.b32.xlu0 %v2406_v14, %s2134_s13  ;;  %s1776_s13 = sshll.u32 %s2240_s22, 7 }
 0x365   : > { %s1649_s16 = scalar_lea.hbm %s2633_s18, %s1776_s13 }
 0x3cf   : > { %v978_v50 = vpop.xlane.xlu1 %977 }
 0x3d0   : > { %v979_v51 = vsub.f32 %v973_v39, %v978_v50 }
 0x3d2   : > { %v980_v52 = vmul.f32 1.442695, %v979_v51  ;;  %v715_v51 = vld [vmem:[%s2588_s7 + $0x10] sm:$0xff] }
 0x3d3   : > { %v990_v53 = vpop.permute.xlu1 %989  ;;  %v1146_v54 = vpop.xlane.xlu0 %1145 }
 0x3d4   : > { %1982 = vpow2.f32 %v980_v52  ;;  %v1147_v55 = vsub.f32 %v1141_v43, %v1146_v54  ;;  %1857 = vmatpush3.msra.mxu1 %v990_v53  ;;  %v713_v52 = vld [vmem:[%s2588_s7] sm:$0xff]  ;;  %v725_v53 = vld [vmem:[%s2590_s9 + $0x38] sm:$0xff]  ;;  %v724_v54 = vld [vmem:[%s2590_s9 + $0x30] sm:$0xff] }
 0x3d5   : > { %1866 = vmatprep.subr.mxu1 %v2126_v0 }
 0x3d6   : > { %v1148_v56 = vmul.f32 1.442695, %v1147_v55  ;;  %v723_v55 = vld [vmem:[%s2590_s9 + $0x28] sm:$0xff] }
 0x3d7   : > { %v1314_v57 = vpop.xlane.xlu0 %1313  ;;  %v1326_v1 = vpop.permute.xlu1 %1325 }
 0x3d8   : > { %1984 = vpow2.f32 %v1148_v56  ;;  %v1315_v58 = vsub.f32 %v1309_v47, %v1314_v57  ;;  %v722_v56 = vld [vmem:[%s2590_s9 + $0x20] sm:$0xff]  ;;  %v721_v57 = vld [vmem:[%s2590_s9 + $0x18] sm:$0xff] }
 0x3da   : > { %v1316_v59 = vmul.f32 1.442695, %v1315_v58 }
 0x3db   : > { %v1158_v61 = vpop.permute.xlu0 %1157 }
 0x3dc   : > { %1986 = vpow2.f32 %v1316_v59 }
 0x3e1   : > { %v1983_v60 = vpop.eup %1982 }
 0x3e2   : > { %1859 = vmatmul.mubr.msk.f32.vlgmr.msra.gmra.mxu1 %vm731_vm2, %v1983_v60  ;;  %v982_v62 = vsel %vm731_vm2, %v1983_v60, 0.0 }
 0x3e3   : > { %1867 = vmatpush3.msra.mxu1 %v1158_v61  ;;  %983 = vadd.xlane.f32.xlu1 %v982_v62  ;;  %v1767_v62 = vld [vmem:[%s2592_s11] ss:$0 sm:$0xff] }
 0x3e4   : > { %1868 = vmatprep.mubr.msk.f32.mxu1 %vm2127_vm0, %v2126_v0  ;;  %1876 = vmatprep.subr.mxu1 %v2126_v0 }
 0x3e5   : > { %v1985_v63 = vpop.eup %1984 }
 0x3e6   : > { %1869 = vmatmul.mubr.msk.f32.vlgmr.msra.gmra.mxu1 %vm731_vm2, %v1985_v63  ;;  %v1150_v3 = vsel %vm731_vm2, %v1985_v63, 0.0 }
 0x3e7   : > { %1877 = vmatpush3.msra.mxu1 %v1326_v1  ;;  %815 = vadd.xlane.f32.xlu1 %v814_v2  ;;  %v1768_v1 = vld [vmem:[%s2593_s12] ss:$0 sm:$0xff] }
 0x3e8   : > { %1151 = vadd.xlane.f32.xlu0 %v1150_v3  ;;  %1878 = vmatprep.mubr.msk.f32.mxu1 %vm2127_vm0, %v2126_v0 }
 0x3e9   : > { %v1987_v4 = vpop.eup %1986  ;;  %1892 = vmatprep.subr.mxu1 %v2126_v0 }
 0x3ea   : > { %1879 = vmatmul.mubr.msk.f32.vlgmr.msra.gmra.mxu1 %vm731_vm2, %v1987_v4  ;;  %v1318_v5 = vsel %vm731_vm2, %v1987_v4, 0.0  ;;  %v720_v4 = vld [vmem:[%s2590_s9 + $0x10] sm:$0xff] }
 0x3eb   : > { %1908 = vmatprep.mubr.msk.f32.mxu1 %vm2127_vm0, %v2126_v0  ;;  %1893 = vmatpush3.msra.mxu1 %v725_v53 }
 0x3ec   : > { %1319 = vadd.xlane.f32.xlu0 %v1318_v5  ;;  %1894 = vmatprep.subr.mxu1 %v2126_v0  ;;  %v719_v5 = vld [vmem:[%s2590_s9 + $0x8] sm:$0xff] }
 0x3ed   : > { %1895 = vmatpush3.msra.mxu1 %v724_v54 }
 0x3ee   : > { %1896 = vmatprep.subr.mxu1 %v2126_v0 }
 0x3ef   : > { %1897 = vmatpush3.msra.mxu1 %v723_v55 }
 0x3f0   : > { %1898 = vmatprep.subr.mxu1 %v2126_v0 }
 0x3f1   : > { %1899 = vmatpush3.msra.mxu1 %v722_v56 }
 0x3f2   : > { %1900 = vmatprep.subr.mxu1 %v2126_v0 }
 0x3f3   : > { %1901 = vmatpush3.msra.mxu1 %v721_v57 }
 0x3f4   : > { %1902 = vmatprep.subr.mxu1 %v2126_v0 }
 0x3f5   : > { %1903 = vmatpush3.msra.mxu1 %v720_v4 }
 0x3f6   : > { %1904 = vmatprep.subr.mxu1 %v2126_v0 }
 0x3f7   : > { %1905 = vmatpush3.msra.mxu1 %v719_v5 }
 0x3f8   : > { %1906 = vmatprep.subr.mxu1 %v2126_v0 }
 0x46c   : > { %v984_v6 = vpop.xlane.xlu1 %983 }
 0x46d   : > { %1988 = vrcp.f32 %v984_v6 }
 0x470   : > { %v816_v31 = vpop.xlane.xlu1 %815 }
 0x471   : > { %v1152_v7 = vpop.xlane.xlu0 %1151 }
 0x472   : > { %1990 = vrcp.f32 %v1152_v7 }
 0x475   : > { %v1320_v8 = vpop.xlane.xlu0 %1319 }
 0x476   : > { %1992 = vrcp.f32 %v1320_v8 }
 0x477   : > { %1994 = vrcp.f32 %v816_v31 }
 0x47a   : > { %v1989_v10 = vpop.eup %1988 }
 0x47b   : > { %v986_v11 = vmul.f32 %v1989_v10, %v984_v6  ;;  %v718_v6 = vld [vmem:[%s2590_s9] sm:$0xff] }
 0x47c   : > { %1907 = vmatpush3.msra.mxu1 %v718_v6 }
 0x47d   : > { %v987_v13 = vsub.f32 2.0, %v986_v11 }
 0x47f   : > { %v1991_v12 = vpop.eup %1990  ;;  %v988_v18 = vmul.f32 %v1989_v10, %v987_v13  ;;  %v1771_v13 = vld [vmem:[%s2591_s10] ss:$0 sm:$0xff] }
 0x480   : > { %v1154_v14 = vmul.f32 %v1991_v12, %v1152_v7  ;;  %v1769_v7 = vld [vmem:[%s2589_s8] ss:$0 sm:$0xff] }
 0x482   : > { %v1155_v16 = vsub.f32 2.0, %v1154_v14 }
 0x483   : > { %v1993_v15 = vpop.eup %1992 }
 0x484   : > { %v1322_v17 = vmul.f32 %v1993_v15, %v1320_v8  ;;  %v1156_v23 = vmul.f32 %v1991_v12, %v1155_v16  ;;  %v1995_v32 = vpop.eup %1994 }
 0x485   : > { %v818_v33 = vmul.f32 %v1995_v32, %v816_v31 }
 0x486   : > { %v1323_v22 = vsub.f32 2.0, %v1322_v17 }
 0x487   : > { %v819_v34 = vsub.f32 2.0, %v818_v33 }
 0x488   : > { %v1324_v27 = vmul.f32 %v1993_v15, %v1323_v22 }
 0x489   : > { %v820_v35 = vmul.f32 %v1995_v32, %v819_v34 }
 0x48b   : > { %v897_v39 = vmul.f32 %v2446_v36, %v820_v35  ;;  %v716_v36 = vld [vmem:[%s2588_s7 + $0x18] sm:$0xff] }
 0x48c   : > { %1882 = vmatpush3.msra.mxu0 %v716_v36 }
 0x48d   : > { %1883 = vmatprep.subr.mxu0 %v2126_v0 }
 0x48e   : > { %1884 = vmatpush3.msra.mxu0 %v715_v51 }
 0x48f   : > { %1885 = vmatprep.subr.mxu0 %v2126_v0 }
 0x4a2   : > { %v1061_v19 = vpop.f32.mrf.mxu1 }
 0x4a3   : > { %v1065_v20 = vmul.f32 %v1061_v19, %v988_v18 }
 0x4a4   : > { %v1860_v21 = vpop.f32.mrf.mxu1 }
 0x4a5   : > { %1403 = vrot.lane.b32.xlu0 %v1065_v20, %s2135_s27  ;;  %s533_s27 = scalar_lea.vmem [#allocation7], %s1747_s21 }
 0x4a6   : > { %v1229_v24 = vpop.f32.mrf.mxu1 }
 0x4a7   : > { %v1233_v25 = vmul.f32 %v1229_v24, %v1156_v23 }
 0x4a8   : > { %v1870_v26 = vpop.f32.mrf.mxu1 }
 0x4a9   : > { %1407 = vrot.lane.b32.xlu1 %v1233_v25, %s2136_s28  ;;  %s1651_s28 = sshll.u32 %s533_s27, 4  ;;  %s1652_s28 = int_to_ptr.vmem [resolvable:$true] %s1651_s28 }
 0x4aa   : > { %v1397_v28 = vpop.f32.mrf.mxu1  ;;  %s2054_s30 = scalar_lea.vmem %s1652_s28, 128 }
 0x4ab   : > { %v1401_v29 = vmul.f32 %v1397_v28, %v1324_v27  ;;  %v1773_v27 = vld [vmem:[%s2631_s14] ss:$0 sm:$0xff]  ;;  %p2055_p11 = scmp.ne.s32.totalorder %s1652_s28, %s2054_s30  ;;  %s2138_s14 = smov [#allocation7]  }
 0x4ac   : > { %v1880_v30 = vpop.f32.mrf.mxu1  ;;  %s2058_s22 = sshll.u32 %s2138_s14, 4  ;;  %s2059_s22 = int_to_ptr.vmem [resolvable:$false] %s2058_s22 }
 0x4ad   : > { %1411 = vrot.lane.b32.xlu1 %v1401_v29, %s2137_s23  ;;  %v1774_v29 = vld [vmem:[%s2632_s26] ss:$0 sm:$0xff]  ;;  %p2056_p10 = pnand %p2055_p11, %p2635_p13  ;;  %s2060_s21 = scalar_lea.vmem %s2059_s22, 256 }
 0x4ae   : > { %p2061_p2 = scmp.lt.s32.totalorder %s1652_s28, %s2059_s22  ;;  %p2062_p0 = scmp.lt.s32.totalorder %s2060_s21, %s2054_s30 }
 0x4af   : > { %p2057_p1 = pneg %p2056_p10 }
 0x4b0   : > { %p2063_p3 = por %p2062_p0, %p2061_p2 }
 0x4b2   : > { %p2064_p12 = pnand %p2063_p3, %p2057_p1 }
 0x517   : > { %v1404_v37 = vpop.permute.xlu0 %1403 }
 0x518   : > { %v1414_v40 = vsel %vm731_vm2, %v897_v39, %v1404_v37 }
 0x51b   : > { %v1408_v38 = vpop.permute.xlu1 %1407 }
 0x51c   : > { %v1416_v41 = vsel %vm1415_vm3, %v1414_v40, %v1408_v38 }
 0x51f   : > { %v1412_v42 = vpop.permute.xlu1 %1411 }
 0x520   : > { %v1418_v43 = vsel %vm1417_vm4, %v1416_v41, %v1412_v42 }
 0x521   : > { %v1419_v44 = vadd.f32 %v1418_v43, %v2386_v9  ;;  %v714_v9 = vld [vmem:[%s2588_s7 + $0x8] sm:$0xff] }
 0x522   : > { %1886 = vmatpush3.msra.mxu0 %v714_v9 }
 0x523   : > { %v1420_v45 = vsel %vm549_vm1, %v1419_v44, 0.0  ;;  %1887 = vmatprep.subr.mxu0 %v2126_v0 }
 0x524   : > { %1421 = vadd.xlane.f32.xlu0 %v1420_v45  ;;  %1888 = vmatpush3.msra.mxu0 %v713_v52 }
 0x5ad   : > { %v1422_v46 = vpop.xlane.xlu0 %1421 }
 0x5ae   : > { %v1424_v47 = vmul.f32 0.03125, %v1422_v46 }
 0x5b0   : > { %v1425_v48 = vsub.f32 %v1419_v44, %v1424_v47 }
 0x5b2   : > { %v1426_v49 = vmul.f32 %v1425_v48, %v1425_v48 }
 0x5b4   : > { %v1427_v50 = vsel %vm549_vm1, %v1426_v49, 0.0 }
 0x5b5   : > { %1428 = vadd.xlane.f32.xlu1 %v1427_v50 }
 0x63e   : > { %v1429_v58 = vpop.xlane.xlu1 %1428 }
 0x63f   : > { %v1430_v59 = vmul.f32 0.03125, %v1429_v58 }
 0x641   : > { %v1431_v60 = vadd.f32 1e-05, %v1430_v59 }
 0x643   : > { %1996 = vrsqrt.f32 %v1431_v60 }
 0x650   : > { %v1997_v61 = vpop.eup %1996 }
 0x651   : > { %v1433_v63 = vmul.f32 %v1997_v61, %v1425_v48 }
 0x653   : > { %v1440_v2 = vmul.f32 %v1767_v62, %v1433_v63 }
 0x655   : > { %v1447_v3 = vadd.f32 %v1768_v1, %v1440_v2 }
 0x657   : > { %1890 = vmatmul.mubr.msk.f32.vlgmr.msra.gmra.mxu0 %vm549_vm1, %v1447_v3 }
 0x717   : > { %v1523_v8 = vpop.f32.mrf.mxu0 }
 0x718   : > { %v1524_v10 = vadd.f32 %v1769_v7, %v1523_v8 }
 0x719   : > { %v1891_v11 = vpop.f32.mrf.mxu0 }
 0x71a   : > { %v1527_v12 = vmax.f32 %v1524_v10, 0.0 }
 0x71c   : > { %1909 = vmatmul.mubr.msk.f32.vlgmr.msra.gmra.mxu1 %vm1534_vm5, %v1527_v12 }
 0x7dc   : > { %v1604_v14 = vpop.f32.mrf.mxu1 }
 0x7dd   : > { %v1605_v15 = vadd.f32 %v1771_v13, %v1604_v14 }
 0x7de   : > { %v1910_v16 = vpop.f32.mrf.mxu1 }
 0x7df   : > { %v1608_v17 = vadd.f32 %v1605_v15, %v1447_v3 }
 0x7e1   : > { %v1609_v0 = vsel %vm549_vm1, %v1608_v17, 0.0 }
 0x7e2   : > { %1610 = vadd.xlane.f32.xlu0 %v1609_v0 }
 0x86b   : > { %v1611_v18 = vpop.xlane.xlu0 %1610 }
 0x86c   : > { %v1612_v19 = vmul.f32 0.03125, %v1611_v18 }
 0x86e   : > { %v1613_v20 = vsub.f32 %v1608_v17, %v1612_v19 }
 0x870   : > { %v1614_v21 = vmul.f32 %v1613_v20, %v1613_v20 }
 0x872   : > { %v1615_v22 = vsel %vm549_vm1, %v1614_v21, 0.0 }
 0x873   : > { %1616 = vadd.xlane.f32.xlu0 %v1615_v22 }
 0x8fc   : > { %v1617_v23 = vpop.xlane.xlu0 %1616 }
 0x8fd   : > { %v1618_v24 = vmul.f32 0.03125, %v1617_v23 }
 0x8ff   : > { %v1619_v25 = vadd.f32 1e-05, %v1618_v24 }
 0x901   : > { %1998 = vrsqrt.f32 %v1619_v25 }
 0x90e   : > { %v1999_v26 = vpop.eup %1998 }
 0x90f   : > { %v1621_v28 = vmul.f32 %v1999_v26, %v1613_v20 }
 0x911   : > { %v1628_v30 = vmul.f32 %v1773_v27, %v1621_v28 }
 0x913   : > { %v1635_v31 = vadd.f32 %v1774_v29, %v1628_v30 }
 0x915   : > { %1636 = vst.msk [vmem:[%s533_s27] sm:$0xff] %vm549_vm1, %v1635_v31 }
 0x916   : > { %2067 = shalt.err (!%p2064_p12)
}
 0x917   : > { %s2068_s6 = scalar_lea.hbm %s1649_s16, 128  ;;  %s2072_s26 = scalar_lea.hbm %s2634_s25, 256 }
 0x918   : > { %p2069_p5 = scmp.ne.s32.totalorder %s1649_s16, %s2068_s6  ;;  %p2073_p6 = scmp.lt.s32.totalorder %s1649_s16, %s2634_s25 }
 0x919   : > { %p2074_p8 = scmp.lt.s32.totalorder %s2072_s26, %s2068_s6 }
 0x91a   : > { %p2070_p7 = pnand %p2069_p5, %p2635_p13 }
 0x91b   : > { %p2075_p9 = por %p2074_p8, %p2073_p6 }
 0x91c   : > { %p2071_p4 = pneg %p2070_p7 }
 0x91e   : > { %p2076_p11 = pnand %p2075_p9, %p2071_p4 }
 0x920   : > { %2079 = shalt.err (!%p2076_p11)
}
 0x921   : > { %1917 = dma.vmem_to_hbm [thread:$0]  (%p2635_p13), %s1652_s28, 128, %s1649_s16, %s1638_s17  }
 0x922 PF: > { %s2636_s23 = sld [smem:[#allocation11_spill]] }
 0x923   : > { %s2637_s15 = sld [smem:[#allocation14_spill]] }
 0x924   : > { %s2638_s18 = sld [smem:[#allocation13_spill]] }
 0x928   : > { %s1663_s30 = sand.u32 1, %s2636_s23  }
 0x929   : > { %p2639_p10 = scmp.ne.s32.totalorder %s2637_s15, 0  ;;  %s1664_s14 = scalar_lea.sflag [#allocation4], %s1663_s30 }
 0x92a   : > { %p2640_p1 = scmp.ge.s32.totalorder %s2638_s18, 2 }
 0x92c   : > { %p1928_p2 = pnand %p2640_p1, %p2639_p10 }
 0x92e   : > { %p1929_p0 = pneg %p1928_p2 }
 0x930   : > { %2105 = dma.done.wait (%p1929_p0), %s1664_s14, 128  }
 0x931   : > { %2107 = vsyncadd (%p1929_p0), %s1664_s14, 4294967168  ;;  %s2641_s21 = sld [smem:[#allocation15_spill]]  ;;  %s2644_s18 = smov %s2114_s19 }
 0x932   : > { %s2642_s22 = sld [smem:[#allocation12_spill]] }
 0x933   : > { %s2643_s20 = sld [smem:[#allocation16_spill]] }
 0x937   : > { %p29_p3 = scmp.ge.s32.totalorder %s2641_s21, 4  }
 0x938   : > { %s2645_s19 = smov %s2642_s22 }
 0x939   :  { %31 = sbr.rel (!%p29_p3) target bundleno = 11 (0xb), region = 132 }
 0x93e   :  { %1669 = vsyncpa [#allocation3], 1 }
 0x93f   :  { %1671 = vsyncpa [#allocation3 + $0x1], 1 }
 0x940   :  { %1672 = vsyncpa [#allocation6], 1 }
 0x941   :  { %1673 = vsyncpa [#allocation4], 1 }
 0x942   :  { %1675 = vsyncpa [#allocation4 + $0x1], 1 }

</bundles_post_ra>
